<compile_context>
chip_gen: v6e
topology: v6e:2x2x1
jax: 0.10.0
libtpu: 0.0.40
codegen_flags: <defaults>
</compile_context>

<pallas_src>
import math
from functools import partial

import jax
import jax.numpy as jnp
from jax import lax
from jax.experimental import pallas as pl
from jax.experimental.pallas import tpu as pltpu

VMEM = pl.BlockSpec(memory_space=pltpu.MemorySpace.VMEM)
VMEM_LIMIT = 32 * 1024 * 1024   # explicit scoped-VMEM budget, safe on v5e/v6e/v7x
MAX_TILE_M = 512                # rows per matmul tile
MAX_TILE_C = 512                # channels per depthwise tile


def _cparams(sem):
    return pltpu.CompilerParams(dimension_semantics=sem, vmem_limit_bytes=VMEM_LIMIT)


# ----------------------------------------------------------------------------
# In-kernel helpers
# ----------------------------------------------------------------------------
def _sigmoid(y):
    # exp and reciprocal both run on the EUP slot (free vs. VALU-bound epilogue)
    return pl.reciprocal(1.0 + jnp.exp(-y), approx=True)


def _apply_act(y, act):
    if act == "swish":
        return y * _sigmoid(y)
    if act == "sigmoid":
        return _sigmoid(y)
    return y


# ----------------------------------------------------------------------------
# Pallas kernels
# ----------------------------------------------------------------------------
def _mm_kernel(x_ref, w_ref, s_ref, b_ref, o_ref, *, act):
    # o = act((bf16(x) @ w_bf16) * scale + bias)   x:(TM,K) w:(K,N) s,b:(1,N)
    x = x_ref[...].astype(jnp.bfloat16)
    y = jnp.dot(x, w_ref[...], preferred_element_type=jnp.float32)
    y = y * s_ref[...] + b_ref[...]
    o_ref[...] = _apply_act(y, act)


def _proj_kernel(x_ref, g_ref, w_ref, s_ref, b_ref, o_ref):
    # project conv with the SE gate fused:  ((x * sigmoid(gate)) @ w) * s + b
    x = x_ref[0] * _sigmoid(g_ref[0])                       # (TM,Ce)*(1,Ce)
    y = jnp.dot(x.astype(jnp.bfloat16), w_ref[...],
                preferred_element_type=jnp.float32)
    o_ref[0] = y * s_ref[...] + b_ref[...]


def _proj_res_kernel(x_ref, g_ref, w_ref, s_ref, b_ref, r_ref, o_ref):
    # same as above + fused identity-skip residual add
    x = x_ref[0] * _sigmoid(g_ref[0])
    y = jnp.dot(x.astype(jnp.bfloat16), w_ref[...],
                preferred_element_type=jnp.float32)
    o_ref[0] = y * s_ref[...] + b_ref[...] + r_ref[0]


def _dw_kernel(x_ref, w_ref, s_ref, b_ref, o_ref, *, k, s):
    # Depthwise KxK conv on phase-decomposed input (only strided outputs are
    # computed), folded BN + swish.
    #   x:(s*s, Hph, Wph, TC)  w:(K*K, TC)  s,b:(1, TC)  o:(1, Ho, Wo, TC)
    _, ho, wo, tc = o_ref.shape
    wv = w_ref[...]                                   # hoisted weight load
    xs = [x_ref[i] for i in range(s * s)]             # hoisted phase loads
    acc = jnp.zeros((ho, wo, tc), jnp.float32)
    for kh in range(k):
        for kw in range(k):
            ph = (kh % s) * s + (kw % s)
            xt = xs[ph][kh // s:kh // s + ho, kw // s:kw // s + wo, :]
            acc = acc + xt * wv[kh * k + kw].reshape(1, 1, tc)
    y = acc * s_ref[...].reshape(1, 1, tc) + b_ref[...].reshape(1, 1, tc)
    o_ref[0] = y * _sigmoid(y)


def _se_gate_kernel(x_ref, wr_ref, br_ref, we_ref, be_ref, o_ref, acc_ref, *, hw, tm):
    # Fused SE path: global average pool + reduce FC + swish + expand FC.
    # Emits pre-sigmoid gate logits (sigmoid is applied inside the project conv).
    j = pl.program_id(1)

    @pl.when(j == 0)
    def _():
        acc_ref[...] = jnp.zeros_like(acc_ref)

    x = x_ref[0]                                      # (TM, Ce)
    if hw % tm != 0:                                  # mask padded rows of last tile
        row = lax.broadcasted_iota(jnp.int32, x.shape, 0) + j * tm
        x = jnp.where(row < hw, x, 0.0)
    acc_ref[...] += jnp.sum(x, axis=0, keepdims=True)

    @pl.when(j == pl.num_programs(1) - 1)
    def _():
        m = acc_ref[...] * (1.0 / hw)                 # (1, Ce) pooled mean
        g = jnp.dot(m.astype(jnp.bfloat16), wr_ref[...],
                    preferred_element_type=jnp.float32) + br_ref[...]
        g = g * _sigmoid(g)                           # swish
        o_ref[0] = jnp.dot(g.astype(jnp.bfloat16), we_ref[...],
                           preferred_element_type=jnp.float32) + be_ref[...]


def _pool_kernel(x_ref, o_ref):
    # Global average pool over H, W:  (N,H,W,C) -> (N,C)   (head pool, small)
    o_ref[...] = jnp.mean(x_ref[...], axis=(1, 2))


# ----------------------------------------------------------------------------
# jitted op wrappers (cache Pallas compiles by shape)
# ----------------------------------------------------------------------------
@partial(jax.jit, static_argnames=("act",))
def matmul_bn_act(x, w, scale, bias, act="none"):
    m, kdim = x.shape
    n = w.shape[1]
    tm = MAX_TILE_M if m > MAX_TILE_M else m
    return pl.pallas_call(
        partial(_mm_kernel, act=act),
        out_shape=jax.ShapeDtypeStruct((m, n), jnp.float32),
        grid=(pl.cdiv(m, tm),),
        in_specs=[
            pl.BlockSpec((tm, kdim), lambda i: (i, 0)),
            pl.BlockSpec((kdim, n), lambda i: (0, 0)),
            pl.BlockSpec((1, n), lambda i: (0, 0)),
            pl.BlockSpec((1, n), lambda i: (0, 0)),
        ],
        out_specs=pl.BlockSpec((tm, n), lambda i: (i, 0)),
        compiler_params=_cparams(("parallel",)),
    )(x, w, scale.reshape(1, n), bias.reshape(1, n))


@jax.jit
def project_conv(x, gate, w, scale, bias, residual=None):
    # x: (N, HW, Ce) f32; gate logits: (N, 1, Ce); w: (Ce, Co) bf16
    n, hw, ce = x.shape
    co = w.shape[1]
    tm = MAX_TILE_M if hw > MAX_TILE_M else hw
    in_specs = [
        pl.BlockSpec((1, tm, ce), lambda i, j: (i, j, 0)),
        pl.BlockSpec((1, 1, ce), lambda i, j: (i, 0, 0)),
        pl.BlockSpec((ce, co), lambda i, j: (0, 0)),
        pl.BlockSpec((1, co), lambda i, j: (0, 0)),
        pl.BlockSpec((1, co), lambda i, j: (0, 0)),
    ]
    args = [x, gate, w, scale.reshape(1, co), bias.reshape(1, co)]
    kern = _proj_kernel
    if residual is not None:
        in_specs.append(pl.BlockSpec((1, tm, co), lambda i, j: (i, j, 0)))
        args.append(residual)
        kern = _proj_res_kernel
    return pl.pallas_call(
        kern,
        out_shape=jax.ShapeDtypeStruct((n, hw, co), jnp.float32),
        grid=(n, pl.cdiv(hw, tm)),
        in_specs=in_specs,
        out_specs=pl.BlockSpec((1, tm, co), lambda i, j: (i, j, 0)),
        compiler_params=_cparams(("parallel", "parallel")),
    )(*args)


@jax.jit
def se_gate(x, wr, br, we, be):
    # x: (N, HW, Ce) -> SE gate logits (N, 1, Ce)
    n, hw, ce = x.shape
    cse = wr.shape[1]
    tm = MAX_TILE_M if hw > MAX_TILE_M else hw
    return pl.pallas_call(
        partial(_se_gate_kernel, hw=hw, tm=tm),
        out_shape=jax.ShapeDtypeStruct((n, 1, ce), jnp.float32),
        grid=(n, pl.cdiv(hw, tm)),
        in_specs=[
            pl.BlockSpec((1, tm, ce), lambda i, j: (i, j, 0)),
            pl.BlockSpec((ce, cse), lambda i, j: (0, 0)),
            pl.BlockSpec((1, cse), lambda i, j: (0, 0)),
            pl.BlockSpec((cse, ce), lambda i, j: (0, 0)),
            pl.BlockSpec((1, ce), lambda i, j: (0, 0)),
        ],
        out_specs=pl.BlockSpec((1, 1, ce), lambda i, j: (i, 0, 0)),
        scratch_shapes=[pltpu.VMEM((1, ce), jnp.float32)],
        compiler_params=_cparams(("parallel", "arbitrary")),
    )(x, wr, br.reshape(1, cse), we, be.reshape(1, ce))


@partial(jax.jit, static_argnames=("k", "stride"))
def depthwise_bn_swish(x, w, scale, bias, *, k, stride):
    # "same" padding (Conv2dStaticSamePadding semantics).  For stride 2 the
    # padded input is phase-decomposed so the kernel only computes the strided
    # outputs (no 4x wasted MACs, no post-hoc subsample pass).
    # TODO(synk): add row-halo spatial tiling for full 380x380 resolution;
    #             current tiling is over (batch, channel-tiles) only.
    n, h, wd, c = x.shape
    s = stride
    ho, wo = -(-h // s), -(-wd // s)
    ph = max((ho - 1) * s + k - h, 0)
    pw = max((wo - 1) * s + k - wd, 0)
    if s == 1:
        xp = jnp.pad(x, ((0, 0), (ph // 2, ph - ph // 2), (pw // 2, pw - pw // 2), (0, 0)))
        hph, wph = h + ph, wd + pw
        phases = xp[:, None]                              # (N,1,Hp,Wp,C)
        p = 1
    else:
        e = (k - 1) // 2
        hph, wph = ho + e, wo + e
        extra_h = 2 * hph - (h + ph)
        extra_w = 2 * wph - (wd + pw)
        xp = jnp.pad(x, ((0, 0),
                         (ph // 2, ph - ph // 2 + extra_h),
                         (pw // 2, pw - pw // 2 + extra_w),
                         (0, 0)))
        phases = jnp.stack([xp[:, a::2, b::2, :] for a in (0, 1) for b in (0, 1)],
                           axis=1)                        # (N,4,Hph,Wph,C)
        p = 4
    phases = phases.reshape(n * p, hph, wph, c)
    tc = c if c <= MAX_TILE_C else MAX_TILE_C
    return pl.pallas_call(
        partial(_dw_kernel, k=k, s=s),
        out_shape=jax.ShapeDtypeStruct((n, ho, wo, c), jnp.float32),
        grid=(n, pl.cdiv(c, tc)),
        in_specs=[
            pl.BlockSpec((p, hph, wph, tc), lambda i, j: (i, 0, 0, j)),
            pl.BlockSpec((k * k, tc), lambda i, j: (0, j)),
            pl.BlockSpec((1, tc), lambda i, j: (0, j)),
            pl.BlockSpec((1, tc), lambda i, j: (0, j)),
        ],
        out_specs=pl.BlockSpec((1, ho, wo, tc), lambda i, j: (i, 0, 0, j)),
        compiler_params=_cparams(("parallel", "parallel")),
    )(phases, w, scale.reshape(1, c), bias.reshape(1, c))


@jax.jit
def global_pool(x):
    n, _, _, c = x.shape
    return pl.pallas_call(
        _pool_kernel,
        out_shape=jax.ShapeDtypeStruct((n, c), jnp.float32),
        in_specs=[VMEM],
        out_specs=VMEM,
    )(x)


# ----------------------------------------------------------------------------
# Network glue (plain JAX)
# ----------------------------------------------------------------------------
def conv1x1_bn_act(x, w, scale, bias, act="none"):
    n, h, wd, c = x.shape
    y = matmul_bn_act(x.reshape(n * h * wd, c), w, scale, bias, act=act)
    return y.reshape(n, h, wd, w.shape[1])


def stem_conv(x, w, scale, bias):
    # 3x3 stride-2 "same" conv via im2col (glue) + tiled bf16 Pallas matmul.
    # TODO(synk): fuse the im2col patch extraction into a dedicated stem kernel
    #             to avoid the 9x patch-buffer HBM round trip at large resolution.
    n, h, wd, c = x.shape
    k, s = 3, 2
    ho, wo = -(-h // s), -(-wd // s)
    ph = max((ho - 1) * s + k - h, 0)
    pw = max((wo - 1) * s + k - wd, 0)
    xp = jnp.pad(x, ((0, 0), (ph // 2, ph - ph // 2), (pw // 2, pw - pw // 2), (0, 0)))
    cols = []
    for kh in range(k):
        for kw in range(k):
            cols.append(xp[:, kh:kh + (ho - 1) * s + 1:s, kw:kw + (wo - 1) * s + 1:s, :])
    pat = jnp.concatenate(cols, axis=-1).reshape(n * ho * wo, k * k * c)
    y = matmul_bn_act(pat, w, scale, bias, act="swish")
    return y.reshape(n, ho, wo, w.shape[1])


def mbconv(x, p):
    n = x.shape[0]
    inputs = x
    if p["expand"] != 1:
        s0, b0 = p["bn0"]
        x = conv1x1_bn_act(x, p["expand_w"], s0, b0, act="swish")
    s1, b1 = p["bn1"]
    x = depthwise_bn_swish(x, p["dw_w"], s1, b1, k=p["k"], stride=p["stride"])
    _, ho, wo, ce = x.shape
    x3 = x.reshape(n, ho * wo, ce)
    # fused squeeze-excite gate (pool + reduce FC + swish + expand FC)
    gate = se_gate(x3, p["se_r_w"], p["se_r_b"], p["se_e_w"], p["se_e_b"])
    # project conv with the SE gate folded in, + identity skip when shapes allow
    s2, b2 = p["bn2"]
    use_skip = (p["stride"] == 1) and (p["cin"] == p["cout"])
    res = inputs.reshape(n, ho * wo, p["cout"]) if use_skip else None
    y = project_conv(x3, gate, p["proj_w"], s2, b2, res)
    return y.reshape(n, ho, wo, p["cout"])


# ----------------------------------------------------------------------------
# EfficientNet-B4 configuration (width 1.4, depth 1.8, divisor 8)
# ----------------------------------------------------------------------------
# (num_repeat, kernel_size, stride, expand_ratio, in_channels, out_channels)
B4_BLOCK_ARGS = [
    (2, 3, 1, 1, 48, 24),
    (4, 3, 2, 6, 24, 32),
    (4, 5, 2, 6, 32, 56),
    (6, 3, 2, 6, 56, 112),
    (6, 5, 1, 6, 112, 160),
    (8, 5, 2, 6, 160, 272),
    (2, 3, 1, 6, 272, 448),
]
STEM_CH = 48
HEAD_CH = 1792
NUM_CLASSES = 2


def init_params(seed=0):
    # Deterministic synthetic parameters (BN folded to scale/bias; matmul weights
    # stored in bf16 for the MXU, depthwise weights kept f32 for the VPU).
    key = jax.random.PRNGKey(seed)
    counter = [0]

    def nxt():
        counter[0] += 1
        return jax.random.fold_in(key, counter[0])

    def conv_w(cin, cout):
        w = jax.random.normal(nxt(), (cin, cout), jnp.float32) * (0.5 / math.sqrt(cin))
        return w.astype(jnp.bfloat16)

    def dw_w(k, c):
        return jax.random.normal(nxt(), (k * k, c), jnp.float32) * (0.5 / math.sqrt(k * k))

    def bn(c):
        s = 1.0 + 0.05 * jax.random.normal(nxt(), (c,), jnp.float32)
        b = 0.05 * jax.random.normal(nxt(), (c,), jnp.float32)
        return s, b

    params = {}
    params["stem_w"] = (jax.random.normal(nxt(), (3 * 3 * 3, STEM_CH), jnp.float32)
                        * (0.5 / math.sqrt(27))).astype(jnp.bfloat16)
    params["stem_bn"] = bn(STEM_CH)

    blocks = []
    for (reps, k, s, e, cin, cout) in B4_BLOCK_ARGS:
        for i in range(reps):
            bcin = cin if i == 0 else cout
            bstride = s if i == 0 else 1
            cexp = bcin * e
            cse = max(1, int(bcin * 0.25))
            p = {"k": k, "stride": bstride, "expand": e, "cin": bcin, "cout": cout}
            if e != 1:
                p["expand_w"] = conv_w(bcin, cexp)
                p["bn0"] = bn(cexp)
            p["dw_w"] = dw_w(k, cexp)
            p["bn1"] = bn(cexp)
            p["se_r_w"] = conv_w(cexp, cse)
            p["se_r_b"] = 0.05 * jax.random.normal(nxt(), (cse,), jnp.float32)
            p["se_e_w"] = conv_w(cse, cexp)
            p["se_e_b"] = 0.05 * jax.random.normal(nxt(), (cexp,), jnp.float32)
            p["proj_w"] = conv_w(cexp, cout)
            p["bn2"] = bn(cout)
            blocks.append(p)
    params["blocks"] = blocks

    params["head_w"] = conv_w(B4_BLOCK_ARGS[-1][5], HEAD_CH)
    params["head_bn"] = bn(HEAD_CH)
    params["fc_w"] = conv_w(HEAD_CH, NUM_CLASSES)
    params["fc_b"] = 0.05 * jax.random.normal(nxt(), (NUM_CLASSES,), jnp.float32)
    return params


def detector_forward(params, x_nchw):
    # layout: input is NCHW (PyTorch convention); transpose to NHWC so channels
    # sit on the TPU lane axis.
    x = jnp.transpose(x_nchw, (0, 2, 3, 1)).astype(jnp.float32)

    # stem
    x = stem_conv(x, params["stem_w"], *params["stem_bn"])

    # MBConv blocks (32 blocks for B4)
    for p in params["blocks"]:
        x = mbconv(x, p)

    # head conv + BN + swish
    hs, hb = params["head_bn"]
    x = conv1x1_bn_act(x, params["head_w"], hs, hb, act="swish")

    # adaptive average pool to 1x1 + flatten
    x = global_pool(x)  # (N, 1792)

    # dropout(p=0.4) is identity at inference
    logits = matmul_bn_act(
        x, params["fc_w"], jnp.ones((NUM_CLASSES,), jnp.float32), params["fc_b"], act="none"
    )
    return logits  # (N, 2)


if __name__ == "__main__":
    key = jax.random.PRNGKey(0)
    x = jax.random.normal(key, (2, 3, 32, 32), jnp.float32)  # small NCHW input
    params = init_params(0)
    out = detector_forward(params, x)
    out = jax.block_until_ready(out)
    assert out.shape == (2, NUM_CLASSES), out.shape
    assert bool(jnp.all(jnp.isfinite(out)))
    print("KERNEL_OK")
</pallas_src>

<mosaic_0001>
module attributes {stable_mosaic.version = 11 : i64} {
  func.func @_mm_kernel(%arg0: i32, %arg1: memref<512x27xf32, #tpu.memory_space<vmem>>, %arg2: memref<27x48xbf16, #tpu.memory_space<vmem>>, %arg3: memref<1x48xf32, #tpu.memory_space<vmem>>, %arg4: memref<1x48xf32, #tpu.memory_space<vmem>>, %arg5: memref<512x48xf32, #tpu.memory_space<vmem>>) attributes {dimension_semantics = [#tpu.dimension_semantics<parallel>], iteration_bounds = array<i64: 1>, scalar_prefetch = 0 : i64, scratch_operands = 0 : i64, tpu.core_type = #tpu.core_type<tc>, window_params = [{transform_indices = @transform_0, window_bounds = array<i64: 512, 27>}, {pipeline_mode = #tpu.pipeline_mode<synchronous>, transform_indices = @transform_1, window_bounds = array<i64: 27, 48>}, {pipeline_mode = #tpu.pipeline_mode<synchronous>, transform_indices = @transform_2, window_bounds = array<i64: 1, 48>}, {pipeline_mode = #tpu.pipeline_mode<synchronous>, transform_indices = @transform_3, window_bounds = array<i64: 1, 48>}, {transform_indices = @transform_4, window_bounds = array<i64: 512, 48>}]} {
    %c0 = arith.constant 0 : index
    %c0_0 = arith.constant 0 : index
    %0 = vector.load %arg1[%c0, %c0_0] : memref<512x27xf32, #tpu.memory_space<vmem>>, vector<512x27xf32>
    %1 = arith.truncf %0 : vector<512x27xf32> to vector<512x27xbf16>
    %c0_1 = arith.constant 0 : index
    %c0_2 = arith.constant 0 : index
    %2 = vector.load %arg2[%c0_1, %c0_2] : memref<27x48xbf16, #tpu.memory_space<vmem>>, vector<27x48xbf16>
    %cst = arith.constant dense<0.000000e+00> : vector<512x48xf32>
    %3 = tpu.matmul %1, %2, %cst {dimension_numbers = #tpu.dot_dimension_numbers<[1], [0], [0], [1], [0, 0, 1, 1], [], []>} : vector<512x27xbf16>, vector<27x48xbf16>, vector<512x48xf32> -> vector<512x48xf32>
    %c0_3 = arith.constant 0 : index
    %c0_4 = arith.constant 0 : index
    %4 = vector.load %arg3[%c0_3, %c0_4] : memref<1x48xf32, #tpu.memory_space<vmem>>, vector<1x48xf32>
    %5 = vector.broadcast %4 : vector<1x48xf32> to vector<512x48xf32>
    %6 = arith.mulf %3, %5 : vector<512x48xf32>
    %c0_5 = arith.constant 0 : index
    %c0_6 = arith.constant 0 : index
    %7 = vector.load %arg4[%c0_5, %c0_6] : memref<1x48xf32, #tpu.memory_space<vmem>>, vector<1x48xf32>
    %8 = vector.broadcast %7 : vector<1x48xf32> to vector<512x48xf32>
    %9 = arith.addf %6, %8 : vector<512x48xf32>
    %cst_7 = arith.constant 0.000000e+00 : f32
    %10 = vector.broadcast %cst_7 : f32 to vector<512x48xf32>
    %11 = arith.subf %10, %9 : vector<512x48xf32>
    %12 = math.exp %11 : vector<512x48xf32>
    %cst_8 = arith.constant 1.000000e+00 : f32
    %13 = vector.broadcast %cst_8 : f32 to vector<512x48xf32>
    %14 = arith.addf %13, %12 : vector<512x48xf32>
    %15 = tpu.reciprocal %14 {approx = true} : vector<512x48xf32> -> vector<512x48xf32>
    %16 = arith.mulf %9, %15 : vector<512x48xf32>
    %c0_9 = arith.constant 0 : index
    %c0_10 = arith.constant 0 : index
    %17 = vector.load %arg5[%c0_9, %c0_10] : memref<512x48xf32, #tpu.memory_space<vmem>>, vector<512x48xf32>
    tpu.vector_store %arg5[%c0_9, %c0_10], %16 {strides = array<i32>} : memref<512x48xf32, #tpu.memory_space<vmem>>, vector<512x48xf32>,
    return
  }
  func.func @transform_0(%arg0: i32) -> (i32, i32) {
    %c0_i32 = arith.constant 0 : i32
    %c0_i32_0 = arith.constant 0 : i32
    return %arg0, %c0_i32 : i32, i32
  }
  func.func @transform_1(%arg0: i32) -> (i32, i32) {
    %c0_i32 = arith.constant 0 : i32
    %c0_i32_0 = arith.constant 0 : i32
    %c0_i32_1 = arith.constant 0 : i32
    return %c0_i32, %c0_i32_0 : i32, i32
  }
  func.func @transform_2(%arg0: i32) -> (i32, i32) {
    %c0_i32 = arith.constant 0 : i32
    %c0_i32_0 = arith.constant 0 : i32
    %c0_i32_1 = arith.constant 0 : i32
    return %c0_i32, %c0_i32_0 : i32, i32
  }
  func.func @transform_3(%arg0: i32) -> (i32, i32) {
    %c0_i32 = arith.constant 0 : i32
    %c0_i32_0 = arith.constant 0 : i32
    %c0_i32_1 = arith.constant 0 : i32
    return %c0_i32, %c0_i32_0 : i32, i32
  }
  func.func @transform_4(%arg0: i32) -> (i32, i32) {
    %c0_i32 = arith.constant 0 : i32
    %c0_i32_0 = arith.constant 0 : i32
    return %arg0, %c0_i32 : i32, i32
  }
}

</mosaic_0001>

<bundles_post_ra>
// kernel: matmul_bn_act.1
= control target key start
LH: loop header
LB: loop body
LE: loop exit
PB: predicated region body
PF: predicated region fallthrough
CT: control target
= control target key end

     0   :  { %vm226_vm0 = vcmask 1044480   ;;  %vm227_vm1 = vcmask 1045504   ;;  %v1520_v1 = vmov 65535   ;;  %vm129_vm2 = vcmask 220160   ;;  %s2463_s1 = inlined_call_operand.vmem [shape: bf16[27,48], index: 1, kind: input, shape index: {}]   ;;  %s2464_s0 = inlined_call_operand.vmem [shape: f32[512,27], index: 0, kind: input, shape index: {}]   ;;  %s2465_s2 = inlined_call_operand.vmem [shape: f32[1,48], index: 2, kind: input, shape index: {}]   ;;  %s2466_s3 = inlined_call_operand.vmem [shape: f32[1,48], index: 3, kind: input, shape index: {}]   ;;  %s2467_s4 = inlined_call_operand.vmem [shape: f32[512,48], index: 4, kind: output, shape index: {}]  }
   0x1   :  { %v1260_v0 = vld [vmem:[%s2463_s1 + $0x8] sm:$0x3f]   ;;  %v228_v2 = vsel %vm226_vm0, 4294967295, %v1520_v1  ;;  %v18_v4 = vld [vmem:[%s2464_s0] sm:$0xff]  ;;  %v20_v12 = vld [vmem:[%s2464_s0 + $0x10] sm:$0xff]  ;;  %vm1048_vm3 = vcmask 392192  }
   0x2   :  { %v229_v3 = vsel %vm227_vm1, %v228_v2, 0  ;;  %v19_v5 = vld [vmem:[%s2464_s0 + $0x8] sm:$0xff]  ;;  %v50_v6 = vld [vmem:[%s2464_s0 + $0x100] sm:$0xff]  ;;  %v21_v13 = vld [vmem:[%s2464_s0 + $0x18] sm:$0xff] }
   0x3   :  { %v231_v7 = vand.u32 %v1260_v0, %v229_v3  ;;  %v1261_v8 = vld [vmem:[%s2463_s1] sm:$0xff]   ;;  %v51_v9 = vld [vmem:[%s2464_s0 + $0x108] sm:$0xff]  ;;  %v82_v10 = vpack.c.bf16 %v19_v5, %v18_v4  ;;  %v52_v14 = vld [vmem:[%s2464_s0 + $0x110] sm:$0xff]  ;;  %v83_v20 = vpack.c.bf16 %v21_v13, %v20_v12 }
   0x4   :  { %v98_v11 = vpack.c.bf16 %v51_v9, %v50_v6  ;;  %v53_v15 = vld [vmem:[%s2464_s0 + $0x118] sm:$0xff]  ;;  %v22_v16 = vld [vmem:[%s2464_s0 + $0x20] sm:$0xff]  ;;  %v23_v17 = vld [vmem:[%s2464_s0 + $0x28] sm:$0xff] }
   0x5   :  { %1187 = vmatprep.subr.bf16.mxu0 %v231_v7  ;;  %1255 = vmatprep.subr.bf16.mxu1 %v231_v7  ;;  %v54_v18 = vld [vmem:[%s2464_s0 + $0x120] sm:$0xff]  ;;  %v55_v19 = vld [vmem:[%s2464_s0 + $0x128] sm:$0xff]  ;;  %v99_v21 = vpack.c.bf16 %v53_v15, %v52_v14  ;;  %v84_v22 = vpack.c.bf16 %v23_v17, %v22_v16  ;;  %v24_v24 = vld [vmem:[%s2464_s0 + $0x30] sm:$0xff] }
   0x6   :  { %1188 = vmatpush3.bf16.msra.mxu0 %v231_v7  ;;  %1257 = vmatpush3.bf16.msra.mxu1 %v231_v7  ;;  %v100_v23 = vpack.c.bf16 %v55_v19, %v54_v18  ;;  %v25_v25 = vld [vmem:[%s2464_s0 + $0x38] sm:$0xff]  ;;  %v56_v26 = vld [vmem:[%s2464_s0 + $0x130] sm:$0xff]  ;;  %v26_v28 = vld [vmem:[%s2464_s0 + $0x40] sm:$0xff] }
   0x7   :  { %1189 = vmatprep.subr.bf16.mxu0 %v1261_v8  ;;  %1256 = vmatprep.subr.bf16.mxu1 %v1261_v8  ;;  %v57_v27 = vld [vmem:[%s2464_s0 + $0x138] sm:$0xff]  ;;  %v27_v29 = vld [vmem:[%s2464_s0 + $0x48] sm:$0xff]  ;;  %v58_v30 = vld [vmem:[%s2464_s0 + $0x140] sm:$0xff]  ;;  %v85_v32 = vpack.c.bf16 %v25_v25, %v24_v24 }
   0x8   :  { %1191 = vmatprep.mubr.msk.bf16.mxu0 %vm129_vm2, %v82_v10  ;;  %1223 = vmatprep.mubr.msk.bf16.mxu1 %vm129_vm2, %v98_v11  ;;  %v59_v31 = vld [vmem:[%s2464_s0 + $0x148] sm:$0xff]  ;;  %v101_v33 = vpack.c.bf16 %v57_v27, %v56_v26  ;;  %v86_v34 = vpack.c.bf16 %v27_v29, %v26_v28  ;;  %v28_v36 = vld [vmem:[%s2464_s0 + $0x50] sm:$0xff]  ;;  %v29_v37 = vld [vmem:[%s2464_s0 + $0x58] sm:$0xff] }
   0x9   :  { %v102_v35 = vpack.c.bf16 %v59_v31, %v58_v30  ;;  %v60_v38 = vld [vmem:[%s2464_s0 + $0x150] sm:$0xff]  ;;  %v61_v39 = vld [vmem:[%s2464_s0 + $0x158] sm:$0xff]  ;;  %v30_v40 = vld [vmem:[%s2464_s0 + $0x60] sm:$0xff]  ;;  %v87_v44 = vpack.c.bf16 %v29_v37, %v28_v36 }
   0xa   :  { %1190 = vmatpush3.bf16.msra.mxu0 %v1261_v8  ;;  %1258 = vmatpush3.bf16.msra.mxu1 %v1261_v8  ;;  %v31_v41 = vld [vmem:[%s2464_s0 + $0x68] sm:$0xff]  ;;  %v62_v42 = vld [vmem:[%s2464_s0 + $0x160] sm:$0xff]  ;;  %v103_v45 = vpack.c.bf16 %v61_v39, %v60_v38  ;;  %v32_v48 = vld [vmem:[%s2464_s0 + $0x70] sm:$0xff] }
   0xb   :  { %v63_v43 = vld [vmem:[%s2464_s0 + $0x168] sm:$0xff]  ;;  %v88_v46 = vpack.c.bf16 %v31_v41, %v30_v40  ;;  %v33_v49 = vld [vmem:[%s2464_s0 + $0x78] sm:$0xff]  ;;  %v64_v50 = vld [vmem:[%s2464_s0 + $0x170] sm:$0xff] }
   0xc   :  { %v104_v47 = vpack.c.bf16 %v63_v43, %v62_v42  ;;  %v65_v51 = vld [vmem:[%s2464_s0 + $0x178] sm:$0xff]  ;;  %v34_v52 = vld [vmem:[%s2464_s0 + $0x80] sm:$0xff]  ;;  %v35_v53 = vld [vmem:[%s2464_s0 + $0x88] sm:$0xff]  ;;  %v89_v56 = vpack.c.bf16 %v33_v49, %v32_v48 }
   0xd   :  { %1192 = vmatmul.mubr.msk.bf16.vlgmr.msra.gmra.mxu0 %vm129_vm2, %v83_v20  ;;  %1224 = vmatmul.mubr.msk.bf16.vlgmr.msra.gmra.mxu1 %vm129_vm2, %v99_v21  ;;  %v66_v54 = vld [vmem:[%s2464_s0 + $0x180] sm:$0xff]  ;;  %v67_v55 = vld [vmem:[%s2464_s0 + $0x188] sm:$0xff]  ;;  %v105_v57 = vpack.c.bf16 %v65_v51, %v64_v50  ;;  %v90_v58 = vpack.c.bf16 %v35_v53, %v34_v52  ;;  %v36_v60 = vld [vmem:[%s2464_s0 + $0x90] sm:$0xff] }
   0xe   :  { %1195 = vmatprep.mubr.msk.bf16.mxu0 %vm129_vm2, %v84_v22  ;;  %1227 = vmatprep.mubr.msk.bf16.mxu1 %vm129_vm2, %v100_v23  ;;  %v106_v59 = vpack.c.bf16 %v67_v55, %v66_v54  ;;  %v37_v61 = vld [vmem:[%s2464_s0 + $0x98] sm:$0xff]  ;;  %v68_v62 = vld [vmem:[%s2464_s0 + $0x190] sm:$0xff]  ;;  %v38_v0 = vld [vmem:[%s2464_s0 + $0xa0] sm:$0xff] }
   0xf   :  { %v69_v63 = vld [vmem:[%s2464_s0 + $0x198] sm:$0xff]  ;;  %v39_v1 = vld [vmem:[%s2464_s0 + $0xa8] sm:$0xff]  ;;  %v70_v2 = vld [vmem:[%s2464_s0 + $0x1a0] sm:$0xff]  ;;  %v91_v4 = vpack.c.bf16 %v37_v61, %v36_v60 }
  0x10   :  { %v71_v3 = vld [vmem:[%s2464_s0 + $0x1a8] sm:$0xff]  ;;  %v107_v5 = vpack.c.bf16 %v69_v63, %v68_v62  ;;  %v92_v6 = vpack.c.bf16 %v39_v1, %v38_v0  ;;  %v40_v8 = vld [vmem:[%s2464_s0 + $0xb0] sm:$0xff]  ;;  %v41_v9 = vld [vmem:[%s2464_s0 + $0xb8] sm:$0xff] }
  0x11   :  { %v108_v7 = vpack.c.bf16 %v71_v3, %v70_v2  ;;  %v72_v10 = vld [vmem:[%s2464_s0 + $0x1b0] sm:$0xff]  ;;  %v73_v11 = vld [vmem:[%s2464_s0 + $0x1b8] sm:$0xff]  ;;  %v42_v12 = vld [vmem:[%s2464_s0 + $0xc0] sm:$0xff]  ;;  %v93_v16 = vpack.c.bf16 %v41_v9, %v40_v8 }
  0x12   :  { %v43_v13 = vld [vmem:[%s2464_s0 + $0xc8] sm:$0xff]  ;;  %v74_v14 = vld [vmem:[%s2464_s0 + $0x1c0] sm:$0xff]  ;;  %v109_v17 = vpack.c.bf16 %v73_v11, %v72_v10  ;;  %v44_v20 = vld [vmem:[%s2464_s0 + $0xd0] sm:$0xff] }
  0x13   :  { %v75_v15 = vld [vmem:[%s2464_s0 + $0x1c8] sm:$0xff]  ;;  %v94_v18 = vpack.c.bf16 %v43_v13, %v42_v12  ;;  %v45_v21 = vld [vmem:[%s2464_s0 + $0xd8] sm:$0xff]  ;;  %v76_v22 = vld [vmem:[%s2464_s0 + $0x1d0] sm:$0xff] }
  0x14   :  { %v110_v19 = vpack.c.bf16 %v75_v15, %v74_v14  ;;  %v77_v23 = vld [vmem:[%s2464_s0 + $0x1d8] sm:$0xff]  ;;  %v46_v24 = vld [vmem:[%s2464_s0 + $0xe0] sm:$0xff]  ;;  %v47_v25 = vld [vmem:[%s2464_s0 + $0xe8] sm:$0xff]  ;;  %v95_v28 = vpack.c.bf16 %v45_v21, %v44_v20 }
  0x15   :  { %1196 = vmatmul.mubr.msk.bf16.gmra.mxu0 %vm129_vm2, %v85_v32  ;;  %1228 = vmatmul.mubr.msk.bf16.gmra.mxu1 %vm129_vm2, %v101_v33  ;;  %v78_v26 = vld [vmem:[%s2464_s0 + $0x1e0] sm:$0xff]  ;;  %v79_v27 = vld [vmem:[%s2464_s0 + $0x1e8] sm:$0xff]  ;;  %v111_v29 = vpack.c.bf16 %v77_v23, %v76_v22  ;;  %v96_v30 = vpack.c.bf16 %v47_v25, %v46_v24  ;;  %v48_v32 = vld [vmem:[%s2464_s0 + $0xf0] sm:$0xff] }
  0x16   :  { %1199 = vmatprep.mubr.msk.bf16.mxu0 %vm129_vm2, %v86_v34  ;;  %1231 = vmatprep.mubr.msk.bf16.mxu1 %vm129_vm2, %v102_v35  ;;  %v112_v31 = vpack.c.bf16 %v79_v27, %v78_v26  ;;  %v49_v33 = vld [vmem:[%s2464_s0 + $0xf8] sm:$0xff]  ;;  %v80_v34 = vld [vmem:[%s2464_s0 + $0x1f0] sm:$0xff]  ;;  %v1779_v38 = vld [vmem:[%s2465_s2] ss:$0 sm:$0xff] }
  0x17   :  { %v81_v35 = vld [vmem:[%s2464_s0 + $0x1f8] sm:$0xff]  ;;  %v97_v36 = vpack.c.bf16 %v49_v33, %v48_v32  ;;  %v1784_v40 = vld [vmem:[%s2466_s3] ss:$0 sm:$0xff] }
  0x18   :  { %v113_v37 = vpack.c.bf16 %v81_v35, %v80_v34 }
  0x1d   :  { %1200 = vmatmul.mubr.msk.bf16.gmra.mxu0 %vm129_vm2, %v87_v44  ;;  %1232 = vmatmul.mubr.msk.bf16.gmra.mxu1 %vm129_vm2, %v103_v45 }
  0x1e   :  { %1203 = vmatprep.mubr.msk.bf16.mxu0 %vm129_vm2, %v88_v46  ;;  %1235 = vmatprep.mubr.msk.bf16.mxu1 %vm129_vm2, %v104_v47 }
  0x25   :  { %1204 = vmatmul.mubr.msk.bf16.gmra.mxu0 %vm129_vm2, %v89_v56  ;;  %1236 = vmatmul.mubr.msk.bf16.gmra.mxu1 %vm129_vm2, %v105_v57 }
  0x26   :  { %1207 = vmatprep.mubr.msk.bf16.mxu0 %vm129_vm2, %v90_v58  ;;  %1239 = vmatprep.mubr.msk.bf16.mxu1 %vm129_vm2, %v106_v59 }
  0x2d   :  { %1208 = vmatmul.mubr.msk.bf16.gmra.mxu0 %vm129_vm2, %v91_v4  ;;  %1240 = vmatmul.mubr.msk.bf16.gmra.mxu1 %vm129_vm2, %v107_v5 }
  0x2e   :  { %1211 = vmatprep.mubr.msk.bf16.mxu0 %vm129_vm2, %v92_v6  ;;  %1243 = vmatprep.mubr.msk.bf16.mxu1 %vm129_vm2, %v108_v7 }
  0x35   :  { %1212 = vmatmul.mubr.msk.bf16.gmra.mxu0 %vm129_vm2, %v93_v16  ;;  %1244 = vmatmul.mubr.msk.bf16.gmra.mxu1 %vm129_vm2, %v109_v17 }
  0x36   :  { %1215 = vmatprep.mubr.msk.bf16.mxu0 %vm129_vm2, %v94_v18  ;;  %1247 = vmatprep.mubr.msk.bf16.mxu1 %vm129_vm2, %v110_v19 }
  0x3d   :  { %1216 = vmatmul.mubr.msk.bf16.gmra.mxu0 %vm129_vm2, %v95_v28  ;;  %1248 = vmatmul.mubr.msk.bf16.gmra.mxu1 %vm129_vm2, %v111_v29 }
  0x3e   :  { %1219 = vmatprep.mubr.msk.bf16.mxu0 %vm129_vm2, %v96_v30  ;;  %1251 = vmatprep.mubr.msk.bf16.mxu1 %vm129_vm2, %v112_v31 }
  0x45   :  { %1220 = vmatmul.mubr.msk.bf16.gmra.mxu0 %vm129_vm2, %v97_v36  ;;  %1252 = vmatmul.mubr.msk.bf16.gmra.mxu1 %vm129_vm2, %v113_v37 }
  0xcd   :  { %v1193_v39 = vpop.f32.mrf.mxu0  ;;  %v1225_v41 = vpop.f32.mrf.mxu1 }
  0xce   :  { %v531_v42 = vmul.f32 %v1193_v39, %v1779_v38  ;;  %v563_v43 = vmul.f32 %v1225_v41, %v1779_v38 }
  0xcf   :  { %v267_v44 = vpop.f32.mrf.mxu0  ;;  %v395_v45 = vpop.f32.mrf.mxu1 }
  0xd0   :  { %v1789_v46 = vadd.f32 %v1784_v40, %v531_v42  ;;  %v1792_v47 = vadd.f32 %v1784_v40, %v563_v43  ;;  %v529_v48 = vmul.f32 %v1779_v38, %v267_v44  ;;  %v561_v49 = vmul.f32 %v1779_v38, %v395_v45 }
  0xd1   :  { %v1194_v50 = vpop.f32.mrf.mxu0  ;;  %v1226_v51 = vpop.f32.mrf.mxu1 }
  0xd2   :  { %v666_v52 = vsub.f32 0.0, %v1789_v46  ;;  %v698_v53 = vsub.f32 0.0, %v1792_v47  ;;  %v1799_v54 = vadd.f32 %v1784_v40, %v529_v48  ;;  %v1802_v55 = vadd.f32 %v1784_v40, %v561_v49 }
  0xd3   :  { %v532_v56 = vmul.f32 %v1194_v50, %v1779_v38  ;;  %v564_v57 = vmul.f32 %v1226_v51, %v1779_v38  ;;  %v270_v58 = vpop.f32.mrf.mxu0  ;;  %v398_v59 = vpop.f32.mrf.mxu1 }
  0xd4   :  { %v732_v60 = vmul.f32 1.442695, %v666_v52  ;;  %v796_v61 = vmul.f32 1.442695, %v698_v53  ;;  %v664_v62 = vsub.f32 0.0, %v1799_v54  ;;  %v696_v63 = vsub.f32 0.0, %v1802_v55 }
  0xd5   :  { %v1809_v0 = vadd.f32 %v1784_v40, %v532_v56  ;;  %v1812_v1 = vadd.f32 %v1784_v40, %v564_v57  ;;  %v530_v2 = vmul.f32 %v1779_v38, %v270_v58  ;;  %v562_v3 = vmul.f32 %v1779_v38, %v398_v59  ;;  %v1197_v4 = vpop.f32.mrf.mxu0  ;;  %v1229_v5 = vpop.f32.mrf.mxu1 }
  0xd6   :  { %1262 = vpow2.f32 %v732_v60  ;;  %v728_v6 = vmul.f32 1.442695, %v664_v62  ;;  %v792_v7 = vmul.f32 1.442695, %v696_v63  ;;  %v535_v8 = vmul.f32 %v1197_v4, %v1779_v38 }
  0xd7   :  { %1264 = vpow2.f32 %v796_v61  ;;  %v667_v9 = vsub.f32 0.0, %v1809_v0  ;;  %v699_v10 = vsub.f32 0.0, %v1812_v1  ;;  %v1820_v11 = vadd.f32 %v1784_v40, %v530_v2  ;;  %v283_v12 = vpop.f32.mrf.mxu0  ;;  %v411_v13 = vpop.f32.mrf.mxu1 }
  0xd8   :  { %1266 = vpow2.f32 %v728_v6  ;;  %v1823_v14 = vadd.f32 %v1784_v40, %v562_v3  ;;  %v1826_v15 = vadd.f32 %v1784_v40, %v535_v8  ;;  %v567_v16 = vmul.f32 %v1229_v5, %v1779_v38 }
  0xd9   :  { %1268 = vpow2.f32 %v792_v7  ;;  %v734_v17 = vmul.f32 1.442695, %v667_v9  ;;  %v798_v18 = vmul.f32 1.442695, %v699_v10  ;;  %v665_v19 = vsub.f32 0.0, %v1820_v11  ;;  %v1198_v20 = vpop.f32.mrf.mxu0  ;;  %v1230_v21 = vpop.f32.mrf.mxu1 }
  0xda   :  { %v697_v22 = vsub.f32 0.0, %v1823_v14  ;;  %v670_v23 = vsub.f32 0.0, %v1826_v15  ;;  %v1833_v24 = vadd.f32 %v1784_v40, %v567_v16  ;;  %v533_v25 = vmul.f32 %v1779_v38, %v283_v12 }
  0xdb   :  { %1270 = vpow2.f32 %v734_v17  ;;  %v730_v26 = vmul.f32 1.442695, %v665_v19  ;;  %v565_v27 = vmul.f32 %v1779_v38, %v411_v13  ;;  %v536_v28 = vmul.f32 %v1198_v20, %v1779_v38  ;;  %v286_v29 = vpop.f32.mrf.mxu0  ;;  %v414_v30 = vpop.f32.mrf.mxu1 }
  0xdc   :  { %1272 = vpow2.f32 %v798_v18  ;;  %v794_v31 = vmul.f32 1.442695, %v697_v22  ;;  %v740_v32 = vmul.f32 1.442695, %v670_v23  ;;  %v702_v33 = vsub.f32 0.0, %v1833_v24 }
  0xdd   :  { %1274 = vpow2.f32 %v730_v26  ;;  %v1840_v34 = vadd.f32 %v1784_v40, %v533_v25  ;;  %v1843_v35 = vadd.f32 %v1784_v40, %v565_v27  ;;  %v1846_v36 = vadd.f32 %v1784_v40, %v536_v28  ;;  %v1201_v37 = vpop.f32.mrf.mxu0  ;;  %v1233_v39 = vpop.f32.mrf.mxu1 }
  0xde   :  { %1276 = vpow2.f32 %v794_v31  ;;  %v804_v41 = vmul.f32 1.442695, %v702_v33  ;;  %v568_v42 = vmul.f32 %v1230_v21, %v1779_v38  ;;  %v534_v43 = vmul.f32 %v1779_v38, %v286_v29 }
  0xdf   :  { %1278 = vpow2.f32 %v740_v32  ;;  %v668_v44 = vsub.f32 0.0, %v1840_v34  ;;  %v700_v45 = vsub.f32 0.0, %v1843_v35  ;;  %v671_v48 = vsub.f32 0.0, %v1846_v36  ;;  %v299_v52 = vpop.f32.mrf.mxu0  ;;  %v427_v59 = vpop.f32.mrf.mxu1 }
  0xe0   :  { %1280 = vpow2.f32 %v804_v41  ;;  %v1854_v49 = vadd.f32 %v1784_v40, %v568_v42  ;;  %v1857_v50 = vadd.f32 %v1784_v40, %v534_v43  ;;  %v566_v51 = vmul.f32 %v1779_v38, %v414_v30 }
  0xe1   :  { %v736_v53 = vmul.f32 1.442695, %v668_v44  ;;  %v800_v56 = vmul.f32 1.442695, %v700_v45  ;;  %v742_v57 = vmul.f32 1.442695, %v671_v48  ;;  %v539_v58 = vmul.f32 %v1201_v37, %v1779_v38  ;;  %v1202_v9 = vpop.f32.mrf.mxu0  ;;  %v1234_v17 = vpop.f32.mrf.mxu1 }
  0xe2   :  { %v703_v60 = vsub.f32 0.0, %v1854_v49  ;;  %v1863_v61 = vadd.f32 %v1784_v40, %v566_v51  ;;  %v571_v62 = vmul.f32 %v1233_v39, %v1779_v38  ;;  %v669_v2 = vsub.f32 0.0, %v1857_v50 }
  0xe3   :  { %v1263_v63 = vpop.eup %1262  ;;  %1282 = vpow2.f32 %v736_v53  ;;  %v1868_v3 = vadd.f32 %v1784_v40, %v539_v58  ;;  %v537_v4 = vmul.f32 %v1779_v38, %v299_v52  ;;  %v569_v8 = vmul.f32 %v1779_v38, %v427_v59  ;;  %v302_v30 = vpop.f32.mrf.mxu0 }
  0xe4   :  { %v1265_v5 = vpop.eup %1264  ;;  %v858_v6 = vadd.f32 1.0, %v1263_v63  ;;  %1284 = vpow2.f32 %v800_v56  ;;  %v806_v7 = vmul.f32 1.442695, %v703_v60  ;;  %v701_v13 = vsub.f32 0.0, %v1863_v61  ;;  %v430_v39 = vpop.f32.mrf.mxu1 }
  0xe5   :  { %v1267_v10 = vpop.eup %1266  ;;  %v890_v12 = vadd.f32 1.0, %v1265_v5  ;;  %1286 = vpow2.f32 %v742_v57  ;;  %v674_v16 = vsub.f32 0.0, %v1868_v3  ;;  %v1875_v20 = vadd.f32 %v1784_v40, %v571_v62  ;;  %v1205_v59 = vpop.f32.mrf.mxu0 }
  0xe6   :  { %v1269_v18 = vpop.eup %1268  ;;  %1288 = vrcp.f32 %v858_v6  ;;  %v856_v19 = vadd.f32 1.0, %v1267_v10  ;;  %v1878_v21 = vadd.f32 %v1784_v40, %v537_v4  ;;  %v738_v23 = vmul.f32 1.442695, %v669_v2  ;;  %v1237_v4 = vpop.f32.mrf.mxu1 }
  0xe7   :  { %1290 = vrcp.f32 %v890_v12  ;;  %v888_v22 = vadd.f32 1.0, %v1269_v18  ;;  %v802_v25 = vmul.f32 1.442695, %v701_v13  ;;  %v706_v27 = vsub.f32 0.0, %v1875_v20  ;;  %v315_v18 = vpop.f32.mrf.mxu0 }
  0xe8   :  { %v1271_v26 = vpop.eup %1270  ;;  %1292 = vrcp.f32 %v856_v19  ;;  %v672_v28 = vsub.f32 0.0, %v1878_v21  ;;  %v1883_v29 = vadd.f32 %v1784_v40, %v569_v8  ;;  %v540_v33 = vmul.f32 %v1202_v9, %v1779_v38 }
  0xe9   :  { %v1273_v31 = vpop.eup %1272  ;;  %1294 = vrcp.f32 %v888_v22  ;;  %v859_v32 = vadd.f32 1.0, %v1271_v26  ;;  %v572_v37 = vmul.f32 %v1234_v17, %v1779_v38  ;;  %v1887_v43 = vmul.f32 1.442695, %v674_v16 }
  0xea   :  { %v1275_v41 = vpop.eup %1274  ;;  %v891_v42 = vadd.f32 1.0, %v1273_v31  ;;  %1296 = vpow2.f32 %v806_v7  ;;  %v1889_v44 = vmul.f32 1.442695, %v706_v27  ;;  %v704_v51 = vsub.f32 0.0, %v1883_v29 }
  0xeb   :  { %v1277_v45 = vpop.eup %1276  ;;  %1298 = vrcp.f32 %v859_v32  ;;  %v857_v48 = vadd.f32 1.0, %v1275_v41  ;;  %v1893_v52 = vadd.f32 %v1784_v40, %v540_v33  ;;  %v1896_v57 = vadd.f32 %v1784_v40, %v572_v37 }
  0xec   :  { %v1279_v53 = vpop.eup %1278  ;;  %1300 = vrcp.f32 %v891_v42  ;;  %v889_v56 = vadd.f32 1.0, %v1277_v45  ;;  %v538_v58 = vmul.f32 %v1779_v38, %v302_v30  ;;  %v744_v63 = vmul.f32 1.442695, %v672_v28  ;;  %v443_v28 = vpop.f32.mrf.mxu1 }
  0xed   :  { %v1281_v60 = vpop.eup %1280  ;;  %1302 = vrcp.f32 %v857_v48  ;;  %v862_v62 = vadd.f32 1.0, %v1279_v53  ;;  %v675_v2 = vsub.f32 0.0, %v1893_v52  ;;  %v707_v6 = vsub.f32 0.0, %v1896_v57  ;;  %v1206_v53 = vpop.f32.mrf.mxu0 }
  0xee   :  { %1304 = vrcp.f32 %v889_v56  ;;  %v894_v5 = vadd.f32 1.0, %v1281_v60  ;;  %v1902_v7 = vadd.f32 %v1784_v40, %v538_v58  ;;  %v808_v8 = vmul.f32 1.442695, %v704_v51  ;;  %v1238_v60 = vpop.f32.mrf.mxu1 }
  0xef   :  { %1306 = vrcp.f32 %v862_v62  ;;  %v570_v9 = vmul.f32 %v1779_v38, %v430_v39  ;;  %v543_v10 = vmul.f32 %v1205_v59, %v1779_v38  ;;  %v1906_v13 = vmul.f32 1.442695, %v675_v2 }
  0xf0   :  { %v1283_v12 = vpop.eup %1282  ;;  %1308 = vrcp.f32 %v894_v5  ;;  %v673_v16 = vsub.f32 0.0, %v1902_v7  ;;  %v575_v17 = vmul.f32 %v1237_v4, %v1779_v38  ;;  %v814_v32 = vmul.f32 1.442695, %v707_v6 }
  0xf1   :  { %v1285_v19 = vpop.eup %1284  ;;  %v860_v22 = vadd.f32 1.0, %v1283_v12  ;;  %1310 = vpow2.f32 %v738_v23  ;;  %v1911_v26 = vadd.f32 %v1784_v40, %v570_v9  ;;  %v1914_v27 = vadd.f32 %v1784_v40, %v543_v10 }
  0xf2   :  { %v1287_v30 = vpop.eup %1286  ;;  %v892_v31 = vadd.f32 1.0, %v1285_v19  ;;  %1312 = vpow2.f32 %v802_v25  ;;  %v1917_v33 = vadd.f32 %v1784_v40, %v575_v17  ;;  %v746_v48 = vmul.f32 1.442695, %v673_v16  ;;  %v318_v16 = vpop.f32.mrf.mxu0 }
  0xf3   :  { %v1289_v37 = vpop.eup %1288  ;;  %1314 = vrcp.f32 %v860_v22  ;;  %v863_v39 = vadd.f32 1.0, %v1287_v30  ;;  %v705_v41 = vsub.f32 0.0, %v1911_v26  ;;  %v678_v23 = vsub.f32 0.0, %v1914_v27 }
  0xf4   :  { %v1291_v42 = vpop.eup %1290  ;;  %v986_v45 = vmul.f32 %v1289_v37, %v1789_v46  ;;  %1316 = vrcp.f32 %v892_v31  ;;  %v541_v51 = vmul.f32 %v1779_v38, %v315_v18  ;;  %v710_v59 = vsub.f32 0.0, %v1917_v33 }
  0xf5   :  { %v1293_v25 = vpop.eup %1292  ;;  %v1018_v56 = vmul.f32 %v1291_v42, %v1792_v47  ;;  %1318 = vrcp.f32 %v863_v39  ;;  %v810_v58 = vmul.f32 1.442695, %v705_v41  ;;  %v756_v2 = vmul.f32 1.442695, %v678_v23  ;;  %v1209_v42 = vpop.f32.mrf.mxu0 }
  0xf6   :  { %v1295_v62 = vpop.eup %1294  ;;  %1051 = vst.msk [vmem:[%s2467_s4 + $0x10] sm:$0xff] %vm1048_vm3, %v986_v45  ;;  %v984_v46 = vmul.f32 %v1293_v25, %v1799_v54  ;;  %1320 = vpow2.f32 %v1887_v43  ;;  %v1932_v4 = vadd.f32 %v1784_v40, %v541_v51  ;;  %v573_v6 = vmul.f32 %v1779_v38, %v443_v28 }
  0xf7   :  { %v1297_v47 = vpop.eup %1296  ;;  %1083 = vst.msk [vmem:[%s2467_s4 + $0x110] sm:$0xff] %vm1048_vm3, %v1018_v56  ;;  %v1016_v5 = vmul.f32 %v1295_v62, %v1802_v55  ;;  %1322 = vpow2.f32 %v1889_v44  ;;  %v544_v54 = vmul.f32 %v1206_v53, %v1779_v38  ;;  %v576_v12 = vmul.f32 %v1238_v60, %v1779_v38 }
  0xf8   :  { %v1299_v9 = vpop.eup %1298  ;;  %1049 = vst.msk [vmem:[%s2467_s4] sm:$0xff] %vm1048_vm3, %v984_v46  ;;  %v895_v43 = vadd.f32 1.0, %v1297_v47  ;;  %1324 = vpow2.f32 %v744_v63  ;;  %v676_v10 = vsub.f32 0.0, %v1932_v4  ;;  %v1954_v17 = vadd.f32 %v1784_v40, %v573_v6  ;;  %v446_v63 = vpop.f32.mrf.mxu1 }
  0xf9   :  { %v1301_v55 = vpop.eup %1300  ;;  %1081 = vst.msk [vmem:[%s2467_s4 + $0x100] sm:$0xff] %vm1048_vm3, %v1016_v5  ;;  %v987_v44 = vmul.f32 %v1299_v9, %v1809_v0  ;;  %1326 = vpow2.f32 %v808_v8  ;;  %v1957_v18 = vadd.f32 %v1784_v40, %v544_v54  ;;  %v820_v28 = vmul.f32 1.442695, %v710_v59  ;;  %v331_v47 = vpop.f32.mrf.mxu0 }
  0xfa   :  { %v1303_v19 = vpop.eup %1302  ;;  %v1019_v22 = vmul.f32 %v1301_v55, %v1812_v1  ;;  %1328 = vrcp.f32 %v895_v43  ;;  %v1961_v30 = vadd.f32 %v1784_v40, %v576_v12  ;;  %v708_v8 = vsub.f32 0.0, %v1954_v17  ;;  %v1241_v53 = vpop.f32.mrf.mxu1 }
  0xfb   :  { %v1305_v31 = vpop.eup %1304  ;;  %1052 = vst.msk [vmem:[%s2467_s4 + $0x18] sm:$0xff] %vm1048_vm3, %v987_v44  ;;  %v985_v0 = vmul.f32 %v1303_v19, %v1820_v11  ;;  %1330 = vpow2.f32 %v1906_v13  ;;  %v679_v37 = vsub.f32 0.0, %v1957_v18  ;;  %v752_v41 = vmul.f32 1.442695, %v676_v10 }
  0xfc   :  { %v1307_v1 = vpop.eup %1306  ;;  %1084 = vst.msk [vmem:[%s2467_s4 + $0x118] sm:$0xff] %vm1048_vm3, %v1019_v22  ;;  %v1017_v39 = vmul.f32 %v1305_v31, %v1823_v14  ;;  %1332 = vpow2.f32 %v814_v32  ;;  %v542_v23 = vmul.f32 %v1779_v38, %v318_v16  ;;  %v816_v45 = vmul.f32 1.442695, %v708_v8  ;;  %v459_v9 = vpop.f32.mrf.mxu1 }
  0xfd   :  { %v1309_v11 = vpop.eup %1308  ;;  %1050 = vst.msk [vmem:[%s2467_s4 + $0x8] sm:$0xff] %vm1048_vm3, %v985_v0  ;;  %v990_v13 = vmul.f32 %v1307_v1, %v1826_v15  ;;  %1334 = vpow2.f32 %v746_v48  ;;  %v711_v51 = vsub.f32 0.0, %v1961_v30  ;;  %v758_v32 = vmul.f32 1.442695, %v679_v37  ;;  %v1210_v22 = vpop.f32.mrf.mxu0 }
  0xfe   :  { %v1311_v25 = vpop.eup %1310  ;;  %1082 = vst.msk [vmem:[%s2467_s4 + $0x108] sm:$0xff] %vm1048_vm3, %v1017_v39  ;;  %v1022_v14 = vmul.f32 %v1309_v11, %v1833_v24  ;;  %1336 = vpow2.f32 %v810_v58  ;;  %v1989_v56 = vadd.f32 %v1784_v40, %v542_v23  ;;  %v574_v48 = vmul.f32 %v1779_v38, %v446_v63  ;;  %v1242_v8 = vpop.f32.mrf.mxu1 }
  0xff   :  { %v1313_v59 = vpop.eup %1312  ;;  %1055 = vst.msk [vmem:[%s2467_s4 + $0x30] sm:$0xff] %vm1048_vm3, %v990_v13  ;;  %v861_v15 = vadd.f32 1.0, %v1311_v25  ;;  %1338 = vpow2.f32 %v756_v2  ;;  %v547_v60 = vmul.f32 %v1209_v42, %v1779_v38  ;;  %v579_v46 = vmul.f32 %v1241_v53, %v1779_v38 }
 0x100   :  { %v1315_v62 = vpop.eup %1314  ;;  %1087 = vst.msk [vmem:[%s2467_s4 + $0x130] sm:$0xff] %vm1048_vm3, %v1022_v14  ;;  %v893_v24 = vadd.f32 1.0, %v1313_v59  ;;  %1340 = vpow2.f32 %v820_v28  ;;  %v677_v58 = vsub.f32 0.0, %v1989_v56  ;;  %v2005_v6 = vadd.f32 %v1784_v40, %v574_v48  ;;  %v334_v14 = vpop.f32.mrf.mxu0 }
 0x101   :  { %v1317_v5 = vpop.eup %1316  ;;  %v988_v2 = vmul.f32 %v1315_v62, %v1840_v34  ;;  %1342 = vrcp.f32 %v861_v15  ;;  %v2008_v54 = vadd.f32 %v1784_v40, %v547_v60  ;;  %v2012_v12 = vadd.f32 %v1784_v40, %v579_v46  ;;  %v462_v60 = vpop.f32.mrf.mxu1 }
 0x102   :  { %v1319_v43 = vpop.eup %1318  ;;  %v1020_v10 = vmul.f32 %v1317_v5, %v1843_v35  ;;  %1344 = vrcp.f32 %v893_v24  ;;  %v822_v55 = vmul.f32 1.442695, %v711_v51  ;;  %v2023_v63 = vmul.f32 1.442695, %v677_v58 }
 0x103   :  { %v1321_v16 = vpop.eup %1320  ;;  %1053 = vst.msk [vmem:[%s2467_s4 + $0x20] sm:$0xff] %vm1048_vm3, %v988_v2  ;;  %v991_v34 = vmul.f32 %v1319_v43, %v1846_v36  ;;  %1346 = vpow2.f32 %v752_v41  ;;  %v545_v19 = vmul.f32 %v1779_v38, %v331_v47  ;;  %v709_v31 = vsub.f32 0.0, %v2005_v6 }
 0x104   :  { %v1323_v44 = vpop.eup %1322  ;;  %1085 = vst.msk [vmem:[%s2467_s4 + $0x120] sm:$0xff] %vm1048_vm3, %v1020_v10  ;;  %v866_v35 = vadd.f32 1.0, %v1321_v16  ;;  %1348 = vpow2.f32 %v816_v45  ;;  %v682_v0 = vsub.f32 0.0, %v2008_v54  ;;  %v714_v39 = vsub.f32 0.0, %v2012_v12 }
 0x105   :  { %v1325_v28 = vpop.eup %1324  ;;  %1056 = vst.msk [vmem:[%s2467_s4 + $0x38] sm:$0xff] %vm1048_vm3, %v991_v34  ;;  %v898_v36 = vadd.f32 1.0, %v1323_v44  ;;  %1350 = vpow2.f32 %v758_v32  ;;  %v2034_v41 = vadd.f32 %v1784_v40, %v545_v19  ;;  %v577_v11 = vmul.f32 %v1779_v38, %v459_v9  ;;  %v1213_v34 = vpop.f32.mrf.mxu0 }
 0x106   :  { %v1327_v37 = vpop.eup %1326  ;;  %1352 = vrcp.f32 %v866_v35  ;;  %v864_v1 = vadd.f32 1.0, %v1325_v28  ;;  %v548_v13 = vmul.f32 %v1210_v22, %v1779_v38  ;;  %v580_v25 = vmul.f32 %v1242_v8, %v1779_v38  ;;  %v1245_v22 = vpop.f32.mrf.mxu1 }
 0x107   :  { %v1329_v23 = vpop.eup %1328  ;;  %1354 = vrcp.f32 %v898_v36  ;;  %v896_v42 = vadd.f32 1.0, %v1327_v37  ;;  %v680_v53 = vsub.f32 0.0, %v2034_v41  ;;  %v2042_v15 = vadd.f32 %v1784_v40, %v577_v11 }
 0x108   :  { %v1331_v45 = vpop.eup %1330  ;;  %v1023_v51 = vmul.f32 %v1329_v23, %v1854_v49  ;;  %1356 = vrcp.f32 %v864_v1  ;;  %v2045_v48 = vadd.f32 %v1784_v40, %v548_v13  ;;  %v818_v24 = vmul.f32 1.442695, %v709_v31 }
 0x109   :  { %v1333_v32 = vpop.eup %1332  ;;  %1358 = vrcp.f32 %v896_v42  ;;  %v867_v59 = vadd.f32 1.0, %v1331_v45  ;;  %v2052_v58 = vadd.f32 %v1784_v40, %v580_v25  ;;  %v2054_v5 = vmul.f32 1.442695, %v682_v0  ;;  %v347_v45 = vpop.f32.mrf.mxu0 }
 0x10a   :  { %v1335_v62 = vpop.eup %1334  ;;  %1088 = vst.msk [vmem:[%s2467_s4 + $0x138] sm:$0xff] %vm1048_vm3, %v1023_v51  ;;  %v899_v49 = vadd.f32 1.0, %v1333_v32  ;;  %1360 = vpow2.f32 %v822_v55  ;;  %v2056_v2 = vmul.f32 1.442695, %v714_v39  ;;  %v2058_v10 = vmul.f32 1.442695, %v680_v53  ;;  %v475_v25 = vpop.f32.mrf.mxu1 }
 0x10b   :  { %v1337_v46 = vpop.eup %1336  ;;  %1362 = vrcp.f32 %v867_v59  ;;  %v865_v47 = vadd.f32 1.0, %v1335_v62  ;;  %v546_v16 = vmul.f32 %v1779_v38, %v334_v14  ;;  %v712_v35 = vsub.f32 0.0, %v2042_v15 }
 0x10c   :  { %v1339_v9 = vpop.eup %1338  ;;  %1364 = vrcp.f32 %v899_v49  ;;  %v897_v43 = vadd.f32 1.0, %v1337_v46  ;;  %v683_v19 = vsub.f32 0.0, %v2045_v48  ;;  %v715_v31 = vsub.f32 0.0, %v2052_v58 }
 0x10d   :  { %v1341_v55 = vpop.eup %1340  ;;  %1366 = vrcp.f32 %v865_v47  ;;  %v870_v44 = vadd.f32 1.0, %v1339_v9  ;;  %v2065_v0 = vadd.f32 %v1784_v40, %v546_v16  ;;  %v578_v1 = vmul.f32 %v1779_v38, %v462_v60 }
 0x10e   :  { %v1343_v28 = vpop.eup %1342  ;;  %1368 = vrcp.f32 %v897_v43  ;;  %v902_v36 = vadd.f32 1.0, %v1341_v55  ;;  %v551_v39 = vmul.f32 %v1213_v34, %v1779_v38  ;;  %v583_v13 = vmul.f32 %v1245_v22, %v1779_v38  ;;  %v1214_v34 = vpop.f32.mrf.mxu0 }
 0x10f   :  { %v1345_v8 = vpop.eup %1344  ;;  %v989_v37 = vmul.f32 %v1343_v28, %v1857_v50  ;;  %1370 = vrcp.f32 %v870_v44  ;;  %v681_v11 = vsub.f32 0.0, %v2065_v0  ;;  %v2079_v53 = vadd.f32 %v1784_v40, %v578_v1  ;;  %v1246_v22 = vpop.f32.mrf.mxu1 }
 0x110   :  { %v1347_v23 = vpop.eup %1346  ;;  %v1021_v42 = vmul.f32 %v1345_v8, %v1863_v61  ;;  %1372 = vrcp.f32 %v902_v36  ;;  %v2082_v61 = vadd.f32 %v1784_v40, %v551_v39  ;;  %v824_v59 = vmul.f32 1.442695, %v712_v35 }
 0x111   :  { %v1349_v51 = vpop.eup %1348  ;;  %1054 = vst.msk [vmem:[%s2467_s4 + $0x28] sm:$0xff] %vm1048_vm3, %v989_v37  ;;  %v868_v50 = vadd.f32 1.0, %v1347_v23  ;;  %1374 = vpow2.f32 %v2023_v63  ;;  %v2089_v60 = vadd.f32 %v1784_v40, %v583_v13  ;;  %v766_v49 = vmul.f32 1.442695, %v683_v19 }
 0x112   :  { %v1351_v14 = vpop.eup %1350  ;;  %1086 = vst.msk [vmem:[%s2467_s4 + $0x128] sm:$0xff] %vm1048_vm3, %v1021_v42  ;;  %v900_v32 = vadd.f32 1.0, %v1349_v51  ;;  %1376 = vpow2.f32 %v818_v24  ;;  %v830_v46 = vmul.f32 1.442695, %v715_v31  ;;  %v762_v43 = vmul.f32 1.442695, %v681_v11 }
 0x113   :  { %v1353_v63 = vpop.eup %1352  ;;  %1378 = vrcp.f32 %v868_v50  ;;  %v871_v62 = vadd.f32 1.0, %v1351_v14  ;;  %v549_v16 = vmul.f32 %v1779_v38, %v347_v45  ;;  %v713_v44 = vsub.f32 0.0, %v2079_v53 }
 0x114   :  { %v1355_v47 = vpop.eup %1354  ;;  %v994_v9 = vmul.f32 %v1353_v63, %v1868_v3  ;;  %1380 = vrcp.f32 %v900_v32  ;;  %v686_v35 = vsub.f32 0.0, %v2082_v61  ;;  %v718_v19 = vsub.f32 0.0, %v2089_v60 }
 0x115   :  { %v1357_v55 = vpop.eup %1356  ;;  %v1026_v24 = vmul.f32 %v1355_v47, %v1875_v20  ;;  %1382 = vrcp.f32 %v871_v62  ;;  %v2104_v20 = vadd.f32 %v1784_v40, %v549_v16  ;;  %v581_v8 = vmul.f32 %v1779_v38, %v475_v25 }
 0x116   :  { %v1359_v28 = vpop.eup %1358  ;;  %1059 = vst.msk [vmem:[%s2467_s4 + $0x50] sm:$0xff] %vm1048_vm3, %v994_v9  ;;  %v992_v3 = vmul.f32 %v1357_v55, %v1878_v21  ;;  %1384 = vpow2.f32 %v2054_v5  ;;  %v552_v21 = vmul.f32 %v1214_v34, %v1779_v38  ;;  %v584_v39 = vmul.f32 %v1246_v22, %v1779_v38 }
 0x117   :  { %v1361_v36 = vpop.eup %1360  ;;  %1091 = vst.msk [vmem:[%s2467_s4 + $0x150] sm:$0xff] %vm1048_vm3, %v1026_v24  ;;  %v1024_v31 = vmul.f32 %v1359_v28, %v1883_v29  ;;  %1386 = vpow2.f32 %v2056_v2  ;;  %v684_v1 = vsub.f32 0.0, %v2104_v20  ;;  %v350_v29 = vpop.f32.mrf.mxu0  ;;  %v2127_v42 = vadd.f32 %v1784_v40, %v581_v8 }
 0x118   :  { %v1363_v5 = vpop.eup %1362  ;;  %1057 = vst.msk [vmem:[%s2467_s4 + $0x40] sm:$0xff] %vm1048_vm3, %v992_v3  ;;  %v903_v37 = vadd.f32 1.0, %v1361_v36  ;;  %1388 = vpow2.f32 %v2058_v10  ;;  %v2130_v11 = vadd.f32 %v1784_v40, %v552_v21  ;;  %v478_v10 = vpop.f32.mrf.mxu1  ;;  %v826_v51 = vmul.f32 1.442695, %v713_v44 }
 0x119   :  { %v1365_v23 = vpop.eup %1364  ;;  %1089 = vst.msk [vmem:[%s2467_s4 + $0x140] sm:$0xff] %vm1048_vm3, %v1024_v31  ;;  %v995_v2 = vmul.f32 %v1363_v5, %v1893_v52  ;;  %1390 = vpow2.f32 %v824_v59  ;;  %v2134_v50 = vadd.f32 %v1784_v40, %v584_v39  ;;  %v772_v14 = vmul.f32 1.442695, %v686_v35  ;;  %v1217_v47 = vpop.f32.mrf.mxu0 }
 0x11a   :  { %v1367_v13 = vpop.eup %1366  ;;  %v1027_v45 = vmul.f32 %v1365_v23, %v1896_v57  ;;  %1392 = vrcp.f32 %v903_v37  ;;  %v716_v32 = vsub.f32 0.0, %v2127_v42  ;;  %v836_v63 = vmul.f32 1.442695, %v718_v19  ;;  %v1249_v34 = vpop.f32.mrf.mxu1 }
 0x11b   :  { %v1369_v25 = vpop.eup %1368  ;;  %1060 = vst.msk [vmem:[%s2467_s4 + $0x58] sm:$0xff] %vm1048_vm3, %v995_v2  ;;  %v993_v52 = vmul.f32 %v1367_v13, %v1902_v7  ;;  %1394 = vpow2.f32 %v766_v49  ;;  %v550_v62 = vmul.f32 %v1779_v38, %v350_v29  ;;  %v768_v49 = vmul.f32 1.442695, %v684_v1  ;;  %v363_v19 = vpop.f32.mrf.mxu0 }
 0x11c   :  { %v1371_v59 = vpop.eup %1370  ;;  %1092 = vst.msk [vmem:[%s2467_s4 + $0x158] sm:$0xff] %vm1048_vm3, %v1027_v45  ;;  %v1025_v57 = vmul.f32 %v1369_v25, %v1911_v26  ;;  %1396 = vpow2.f32 %v830_v46  ;;  %v687_v16 = vsub.f32 0.0, %v2130_v11  ;;  %v832_v46 = vmul.f32 1.442695, %v716_v32  ;;  %v491_v5 = vpop.f32.mrf.mxu1 }
 0x11d   :  { %v1373_v9 = vpop.eup %1372  ;;  %1058 = vst.msk [vmem:[%s2467_s4 + $0x48] sm:$0xff] %vm1048_vm3, %v993_v52  ;;  %v998_v7 = vmul.f32 %v1371_v59, %v1914_v27  ;;  %1398 = vpow2.f32 %v762_v43  ;;  %v719_v24 = vsub.f32 0.0, %v2134_v50  ;;  %v582_v43 = vmul.f32 %v1779_v38, %v478_v10  ;;  %v1218_v45 = vpop.f32.mrf.mxu0 }
 0x11e   :  { %v1375_v55 = vpop.eup %1374  ;;  %1090 = vst.msk [vmem:[%s2467_s4 + $0x148] sm:$0xff] %vm1048_vm3, %v1025_v57  ;;  %v1030_v26 = vmul.f32 %v1373_v9, %v1917_v33  ;;  %1400 = vpow2.f32 %v826_v51  ;;  %v555_v35 = vmul.f32 %v1217_v47, %v1779_v38  ;;  %v2171_v28 = vadd.f32 %v1784_v40, %v550_v62 }
 0x11f   :  { %v1377_v44 = vpop.eup %1376  ;;  %1063 = vst.msk [vmem:[%s2467_s4 + $0x70] sm:$0xff] %vm1048_vm3, %v998_v7  ;;  %v869_v27 = vadd.f32 1.0, %v1375_v55  ;;  %1402 = vpow2.f32 %v772_v14  ;;  %v587_v3 = vmul.f32 %v1249_v34, %v1779_v38  ;;  %v774_v8 = vmul.f32 1.442695, %v687_v16  ;;  %v1250_v14 = vpop.f32.mrf.mxu1 }
 0x120   :  { %v1379_v22 = vpop.eup %1378  ;;  %1095 = vst.msk [vmem:[%s2467_s4 + $0x170] sm:$0xff] %vm1048_vm3, %v1030_v26  ;;  %v901_v33 = vadd.f32 1.0, %v1377_v44  ;;  %1404 = vpow2.f32 %v836_v63  ;;  %v2176_v21 = vadd.f32 %v1784_v40, %v582_v43  ;;  %v2180_v39 = vadd.f32 %v1784_v40, %v555_v35  ;;  %v366_v26 = vpop.f32.mrf.mxu0 }
 0x121   :  { %v1381_v36 = vpop.eup %1380  ;;  %v996_v31 = vmul.f32 %v1379_v22, %v1932_v4  ;;  %1406 = vrcp.f32 %v869_v27  ;;  %v2183_v29 = vadd.f32 %v1784_v40, %v587_v3  ;;  %v685_v10 = vsub.f32 0.0, %v2171_v28  ;;  %v494_v43 = vpop.f32.mrf.mxu1 }
 0x122   :  { %v1383_v37 = vpop.eup %1382  ;;  %v1028_v1 = vmul.f32 %v1381_v36, %v1954_v17  ;;  %1408 = vrcp.f32 %v901_v33  ;;  %v553_v13 = vmul.f32 %v1779_v38, %v363_v19  ;;  %v838_v25 = vmul.f32 1.442695, %v719_v24 }
 0x123   :  { %v1385_v23 = vpop.eup %1384  ;;  %1061 = vst.msk [vmem:[%s2467_s4 + $0x60] sm:$0xff] %vm1048_vm3, %v996_v31  ;;  %v999_v4 = vmul.f32 %v1383_v37, %v1957_v18  ;;  %1410 = vpow2.f32 %v768_v49  ;;  %v717_v52 = vsub.f32 0.0, %v2176_v21  ;;  %v690_v57 = vsub.f32 0.0, %v2180_v39  ;;  %v2228_v37 = vld [vmem:[%s2465_s2] ss:$0 sm:$0xff] }
 0x124   :  { %v1387_v2 = vpop.eup %1386  ;;  %1093 = vst.msk [vmem:[%s2467_s4 + $0x160] sm:$0xff] %vm1048_vm3, %v1028_v1  ;;  %v874_v17 = vadd.f32 1.0, %v1385_v23  ;;  %1412 = vpow2.f32 %v832_v46  ;;  %v722_v63 = vsub.f32 0.0, %v2183_v29  ;;  %v585_v9 = vmul.f32 %v1779_v38, %v491_v5  ;;  %v1221_v1 = vpop.f32.mrf.mxu0 }
 0x125   :  { %v1389_v51 = vpop.eup %1388  ;;  %1064 = vst.msk [vmem:[%s2467_s4 + $0x78] sm:$0xff] %vm1048_vm3, %v999_v4  ;;  %v906_v18 = vadd.f32 1.0, %v1387_v2  ;;  %1414 = vpow2.f32 %v774_v8  ;;  %v556_v7 = vmul.f32 %v1218_v45, %v1779_v38  ;;  %v770_v34 = vmul.f32 1.442695, %v685_v10 }
 0x126   :  { %v1391_v32 = vpop.eup %1390  ;;  %1416 = vrcp.f32 %v874_v17  ;;  %v872_v59 = vadd.f32 1.0, %v1389_v51  ;;  %v2207_v55 = vadd.f32 %v1784_v40, %v553_v13  ;;  %v2210_v44 = vadd.f32 %v1784_v40, %v585_v9  ;;  %v2235_v17 = vld [vmem:[%s2466_s3] ss:$0 sm:$0xff]  ;;  %v1253_v13 = vpop.f32.mrf.mxu1 }
 0x127   :  { %v1393_v62 = vpop.eup %1392  ;;  %1418 = vrcp.f32 %v906_v18  ;;  %v904_v47 = vadd.f32 1.0, %v1391_v32  ;;  %v588_v27 = vmul.f32 %v1250_v14, %v1779_v38  ;;  %v834_v22 = vmul.f32 1.442695, %v717_v52  ;;  %v379_v9 = vpop.f32.mrf.mxu0 }
 0x128   :  { %v1395_v49 = vpop.eup %1394  ;;  %v1031_v16 = vmul.f32 %v1393_v62, %v1961_v30  ;;  %1420 = vrcp.f32 %v872_v59  ;;  %v2218_v33 = vadd.f32 %v1784_v40, %v556_v7  ;;  %v2220_v36 = vmul.f32 1.442695, %v690_v57 }
 0x129   :  { %v1397_v46 = vpop.eup %1396  ;;  %1422 = vrcp.f32 %v904_v47  ;;  %v875_v24 = vadd.f32 1.0, %v1395_v49  ;;  %v2222_v31 = vmul.f32 1.442695, %v722_v63  ;;  %v688_v5 = vsub.f32 0.0, %v2207_v55 }
 0x12a   :  { %v1399_v35 = vpop.eup %1398  ;;  %1096 = vst.msk [vmem:[%s2467_s4 + $0x178] sm:$0xff] %vm1048_vm3, %v1031_v16  ;;  %v907_v30 = vadd.f32 1.0, %v1397_v46  ;;  %1424 = vpow2.f32 %v838_v25  ;;  %v554_v40 = vmul.f32 %v2228_v37, %v366_v26  ;;  %v720_v2 = vsub.f32 0.0, %v2210_v44 }
 0x12b   :  { %v1401_v3 = vpop.eup %1400  ;;  %1426 = vrcp.f32 %v875_v24  ;;  %v873_v19 = vadd.f32 1.0, %v1399_v35  ;;  %v2238_v10 = vadd.f32 %v2235_v17, %v588_v27  ;;  %v691_v18 = vsub.f32 0.0, %v2218_v33 }
 0x12c   :  { %v1403_v38 = vpop.eup %1402  ;;  %1428 = vrcp.f32 %v907_v30  ;;  %v905_v8 = vadd.f32 1.0, %v1401_v3  ;;  %v2242_v25 = vadd.f32 %v2235_v17, %v554_v40  ;;  %v586_v32 = vmul.f32 %v2228_v37, %v494_v43  ;;  %v507_v30 = vpop.f32.mrf.mxu1 }
 0x12d   :  { %v1405_v23 = vpop.eup %1404  ;;  %1430 = vrcp.f32 %v873_v19  ;;  %v878_v4 = vadd.f32 1.0, %v1403_v38  ;;  %v559_v59 = vmul.f32 %v2228_v37, %v1221_v1  ;;  %v776_v62 = vmul.f32 1.442695, %v688_v5 }
 0x12e   :  { %v1407_v45 = vpop.eup %1406  ;;  %1432 = vrcp.f32 %v905_v8  ;;  %v910_v51 = vadd.f32 1.0, %v1405_v23  ;;  %v591_v47 = vmul.f32 %v2228_v37, %v1253_v13  ;;  %v723_v49 = vsub.f32 0.0, %v2238_v10  ;;  %v1222_v8 = vpop.f32.mrf.mxu0 }
 0x12f   :  { %v1409_v52 = vpop.eup %1408  ;;  %v997_v14 = vmul.f32 %v1407_v45, %v1989_v56  ;;  %1434 = vrcp.f32 %v878_v4  ;;  %v2255_v16 = vadd.f32 %v2235_v17, %v586_v32  ;;  %v840_v46 = vmul.f32 1.442695, %v720_v2 }
 0x130   :  { %v1411_v57 = vpop.eup %1410  ;;  %v1029_v63 = vmul.f32 %v1409_v52, %v2005_v6  ;;  %1436 = vrcp.f32 %v910_v51  ;;  %v2262_v24 = vadd.f32 %v2235_v17, %v559_v59  ;;  %v782_v43 = vmul.f32 1.442695, %v691_v18 }
 0x131   :  { %v1413_v7 = vpop.eup %1412  ;;  %1062 = vst.msk [vmem:[%s2467_s4 + $0x68] sm:$0xff] %vm1048_vm3, %v997_v14  ;;  %v876_v56 = vadd.f32 1.0, %v1411_v57  ;;  %1438 = vpow2.f32 %v770_v34  ;;  %v689_v35 = vsub.f32 0.0, %v2242_v25  ;;  %v2267_v38 = vadd.f32 %v2235_v17, %v591_v47 }
 0x132   :  { %v1415_v26 = vpop.eup %1414  ;;  %1094 = vst.msk [vmem:[%s2467_s4 + $0x168] sm:$0xff] %vm1048_vm3, %v1029_v63  ;;  %v908_v6 = vadd.f32 1.0, %v1413_v7  ;;  %1440 = vpow2.f32 %v834_v22  ;;  %v557_v22 = vmul.f32 %v2228_v37, %v379_v9  ;;  %v846_v1 = vmul.f32 1.442695, %v723_v49 }
 0x133   :  { %v1417_v27 = vpop.eup %1416  ;;  %1442 = vrcp.f32 %v876_v56  ;;  %v879_v34 = vadd.f32 1.0, %v1415_v26  ;;  %v721_v23 = vsub.f32 0.0, %v2255_v16  ;;  %v694_v2 = vsub.f32 0.0, %v2262_v24 }
 0x134   :  { %v1419_v3 = vpop.eup %1418  ;;  %v1002_v19 = vmul.f32 %v1417_v27, %v2008_v54  ;;  %1444 = vrcp.f32 %v908_v6  ;;  %v2280_v13 = vadd.f32 %v2235_v17, %v557_v22  ;;  %v589_v51 = vmul.f32 %v2228_v37, %v507_v30  ;;  %v382_v30 = vpop.f32.mrf.mxu0 }
 0x135   :  { %v1421_v5 = vpop.eup %1420  ;;  %v1034_v40 = vmul.f32 %v1419_v3, %v2012_v12  ;;  %1446 = vrcp.f32 %v879_v34  ;;  %v778_v14 = vmul.f32 1.442695, %v689_v35  ;;  %v726_v32 = vsub.f32 0.0, %v2267_v38 }
 0x136   :  { %v1423_v4 = vpop.eup %1422  ;;  %1067 = vst.msk [vmem:[%s2467_s4 + $0x90] sm:$0xff] %vm1048_vm3, %v1002_v19  ;;  %v1000_v54 = vmul.f32 %v1421_v5, %v2034_v41  ;;  %1448 = vpow2.f32 %v2220_v36  ;;  %v560_v41 = vmul.f32 %v2228_v37, %v1222_v8  ;;  %v1254_v36 = vpop.f32.mrf.mxu1  ;;  %v842_v47 = vmul.f32 1.442695, %v721_v23 }
 0x137   :  { %v1425_v12 = vpop.eup %1424  ;;  %1099 = vst.msk [vmem:[%s2467_s4 + $0x190] sm:$0xff] %vm1048_vm3, %v1034_v40  ;;  %v1032_v45 = vmul.f32 %v1423_v4, %v2042_v15  ;;  %1450 = vpow2.f32 %v2222_v31  ;;  %v2301_v31 = vadd.f32 %v2235_v17, %v589_v51  ;;  %v592_v9 = vmul.f32 %v2228_v37, %v1254_v36 }
 0x138   :  { %v1427_v18 = vpop.eup %1426  ;;  %1065 = vst.msk [vmem:[%s2467_s4 + $0x80] sm:$0xff] %vm1048_vm3, %v1000_v54  ;;  %v911_v52 = vadd.f32 1.0, %v1425_v12  ;;  %1452 = vpow2.f32 %v776_v62  ;;  %v2304_v57 = vadd.f32 %v2235_v17, %v560_v41  ;;  %v788_v56 = vmul.f32 1.442695, %v694_v2  ;;  %v510_v22 = vpop.f32.mrf.mxu1 }
 0x139   :  { %v1429_v59 = vpop.eup %1428  ;;  %1097 = vst.msk [vmem:[%s2467_s4 + $0x180] sm:$0xff] %vm1048_vm3, %v1032_v45  ;;  %v1003_v15 = vmul.f32 %v1427_v18, %v2045_v48  ;;  %1454 = vpow2.f32 %v840_v46  ;;  %v692_v49 = vsub.f32 0.0, %v2280_v13  ;;  %v852_v6 = vmul.f32 1.442695, %v726_v32 }
 0x13a   :  { %v1431_v63 = vpop.eup %1430  ;;  %v1035_v62 = vmul.f32 %v1429_v59, %v2052_v58  ;;  %1456 = vrcp.f32 %v911_v52  ;;  %v724_v46 = vsub.f32 0.0, %v2301_v31  ;;  %v695_v34 = vsub.f32 0.0, %v2304_v57 }
 0x13b   :  { %v1433_v7 = vpop.eup %1432  ;;  %1068 = vst.msk [vmem:[%s2467_s4 + $0x98] sm:$0xff] %vm1048_vm3, %v1003_v15  ;;  %v1001_v48 = vmul.f32 %v1431_v63, %v2065_v0  ;;  %1458 = vpow2.f32 %v782_v43  ;;  %v2332_v35 = vadd.f32 %v2235_v17, %v592_v9  ;;  %v784_v19 = vmul.f32 1.442695, %v692_v49 }
 0x13c   :  { %v1435_v26 = vpop.eup %1434  ;;  %1100 = vst.msk [vmem:[%s2467_s4 + $0x198] sm:$0xff] %vm1048_vm3, %v1035_v62  ;;  %v1033_v58 = vmul.f32 %v1433_v7, %v2079_v53  ;;  %1460 = vpow2.f32 %v846_v1  ;;  %v848_v5 = vmul.f32 1.442695, %v724_v46  ;;  %v790_v23 = vmul.f32 1.442695, %v695_v34 }
 0x13d   :  { %v1437_v27 = vpop.eup %1436  ;;  %1066 = vst.msk [vmem:[%s2467_s4 + $0x88] sm:$0xff] %vm1048_vm3, %v1001_v48  ;;  %v1006_v0 = vmul.f32 %v1435_v26, %v2082_v61  ;;  %1462 = vpow2.f32 %v778_v14  ;;  %v558_v4 = vmul.f32 %v2228_v37, %v382_v30  ;;  %v727_v12 = vsub.f32 0.0, %v2332_v35 }
 0x13e   :  { %v1439_v43 = vpop.eup %1438  ;;  %1098 = vst.msk [vmem:[%s2467_s4 + $0x188] sm:$0xff] %vm1048_vm3, %v1033_v58  ;;  %v1038_v53 = vmul.f32 %v1437_v27, %v2089_v60  ;;  %1464 = vpow2.f32 %v842_v47  ;;  %v590_v45 = vmul.f32 %v2228_v37, %v510_v22 }
 0x13f   :  { %v1441_v3 = vpop.eup %1440  ;;  %1071 = vst.msk [vmem:[%s2467_s4 + $0xb0] sm:$0xff] %vm1048_vm3, %v1006_v0  ;;  %v877_v61 = vadd.f32 1.0, %v1439_v43  ;;  %1466 = vpow2.f32 %v788_v56  ;;  %v2361_v18 = vadd.f32 %v2235_v17, %v558_v4  ;;  %v854_v14 = vmul.f32 1.442695, %v727_v12 }
 0x140   :  { %v1443_v8 = vpop.eup %1442  ;;  %1103 = vst.msk [vmem:[%s2467_s4 + $0x1b0] sm:$0xff] %vm1048_vm3, %v1038_v53  ;;  %v909_v60 = vadd.f32 1.0, %v1441_v3  ;;  %1468 = vpow2.f32 %v852_v6  ;;  %v2364_v32 = vadd.f32 %v2235_v17, %v590_v45 }
 0x141   :  { %v1445_v40 = vpop.eup %1444  ;;  %v1004_v1 = vmul.f32 %v1443_v8, %v2104_v20  ;;  %1470 = vrcp.f32 %v877_v61  ;;  %v693_v7 = vsub.f32 0.0, %v2361_v18 }
 0x142   :  { %v1447_v54 = vpop.eup %1446  ;;  %v1036_v2 = vmul.f32 %v1445_v40, %v2127_v42  ;;  %1472 = vrcp.f32 %v909_v60  ;;  %v725_v56 = vsub.f32 0.0, %v2364_v32 }
 0x143   :  { %v1449_v51 = vpop.eup %1448  ;;  %1069 = vst.msk [vmem:[%s2467_s4 + $0xa0] sm:$0xff] %vm1048_vm3, %v1004_v1  ;;  %v1007_v20 = vmul.f32 %v1447_v54, %v2130_v11  ;;  %1474 = vpow2.f32 %v784_v19  ;;  %v786_v27 = vmul.f32 1.442695, %v693_v7 }
 0x144   :  { %v1451_v41 = vpop.eup %1450  ;;  %1101 = vst.msk [vmem:[%s2467_s4 + $0x1a0] sm:$0xff] %vm1048_vm3, %v1036_v2  ;;  %v882_v42 = vadd.f32 1.0, %v1449_v51  ;;  %1476 = vpow2.f32 %v848_v5  ;;  %v850_v43 = vmul.f32 1.442695, %v725_v56 }
 0x145   :  { %v1453_v36 = vpop.eup %1452  ;;  %1072 = vst.msk [vmem:[%s2467_s4 + $0xb8] sm:$0xff] %vm1048_vm3, %v1007_v20  ;;  %v914_v37 = vadd.f32 1.0, %v1451_v41  ;;  %1478 = vpow2.f32 %v790_v23 }
 0x146   :  { %v1455_v11 = vpop.eup %1454  ;;  %1480 = vrcp.f32 %v882_v42  ;;  %v880_v52 = vadd.f32 1.0, %v1453_v36 }
 0x147   :  { %v1457_v59 = vpop.eup %1456  ;;  %1482 = vrcp.f32 %v914_v37  ;;  %v912_v15 = vadd.f32 1.0, %v1455_v11 }
 0x148   :  { %v1459_v63 = vpop.eup %1458  ;;  %v1039_v62 = vmul.f32 %v1457_v59, %v2134_v50  ;;  %1484 = vrcp.f32 %v880_v52 }
 0x149   :  { %v1461_v47 = vpop.eup %1460  ;;  %1486 = vrcp.f32 %v912_v15  ;;  %v883_v9 = vadd.f32 1.0, %v1459_v63 }
 0x14a   :  { %v1463_v48 = vpop.eup %1462  ;;  %1104 = vst.msk [vmem:[%s2467_s4 + $0x1b8] sm:$0xff] %vm1048_vm3, %v1039_v62  ;;  %v915_v17 = vadd.f32 1.0, %v1461_v47  ;;  %1488 = vpow2.f32 %v854_v14 }
 0x14b   :  { %v1465_v49 = vpop.eup %1464  ;;  %1490 = vrcp.f32 %v883_v9  ;;  %v881_v26 = vadd.f32 1.0, %v1463_v48 }
 0x14c   :  { %v1467_v50 = vpop.eup %1466  ;;  %1492 = vrcp.f32 %v915_v17  ;;  %v913_v58 = vadd.f32 1.0, %v1465_v49 }
 0x14d   :  { %v1469_v6 = vpop.eup %1468  ;;  %1494 = vrcp.f32 %v881_v26  ;;  %v886_v46 = vadd.f32 1.0, %v1467_v50 }
 0x14e   :  { %v1471_v0 = vpop.eup %1470  ;;  %1496 = vrcp.f32 %v913_v58  ;;  %v918_v34 = vadd.f32 1.0, %v1469_v6 }
 0x14f   :  { %v1473_v53 = vpop.eup %1472  ;;  %v1005_v30 = vmul.f32 %v1471_v0, %v2171_v28  ;;  %1498 = vrcp.f32 %v886_v46 }
 0x150   :  { %v1475_v3 = vpop.eup %1474  ;;  %v1037_v61 = vmul.f32 %v1473_v53, %v2176_v21  ;;  %1500 = vrcp.f32 %v918_v34 }
 0x151   :  { %v1477_v19 = vpop.eup %1476  ;;  %1070 = vst.msk [vmem:[%s2467_s4 + $0xa8] sm:$0xff] %vm1048_vm3, %v1005_v30  ;;  %v884_v22 = vadd.f32 1.0, %v1475_v3  ;;  %1502 = vpow2.f32 %v786_v27 }
 0x152   :  { %v1479_v8 = vpop.eup %1478  ;;  %1102 = vst.msk [vmem:[%s2467_s4 + $0x1a8] sm:$0xff] %vm1048_vm3, %v1037_v61  ;;  %v916_v28 = vadd.f32 1.0, %v1477_v19  ;;  %1504 = vpow2.f32 %v850_v43 }
 0x153   :  { %v1481_v60 = vpop.eup %1480  ;;  %1506 = vrcp.f32 %v884_v22  ;;  %v887_v21 = vadd.f32 1.0, %v1479_v8 }
 0x154   :  { %v1483_v5 = vpop.eup %1482  ;;  %v1010_v40 = vmul.f32 %v1481_v60, %v2180_v39  ;;  %1508 = vrcp.f32 %v916_v28 }
 0x155   :  { %v1485_v1 = vpop.eup %1484  ;;  %v1042_v23 = vmul.f32 %v1483_v5, %v2183_v29  ;;  %1510 = vrcp.f32 %v887_v21 }
 0x156   :  { %v1487_v4 = vpop.eup %1486  ;;  %1075 = vst.msk [vmem:[%s2467_s4 + $0xd0] sm:$0xff] %vm1048_vm3, %v1010_v40  ;;  %v1008_v54 = vmul.f32 %v1485_v1, %v2207_v55 }
 0x157   :  { %v1489_v2 = vpop.eup %1488  ;;  %1107 = vst.msk [vmem:[%s2467_s4 + $0x1d0] sm:$0xff] %vm1048_vm3, %v1042_v23  ;;  %v1040_v39 = vmul.f32 %v1487_v4, %v2210_v44 }
 0x158   :  { %v1491_v12 = vpop.eup %1490  ;;  %1073 = vst.msk [vmem:[%s2467_s4 + $0xc0] sm:$0xff] %vm1048_vm3, %v1008_v54  ;;  %v919_v29 = vadd.f32 1.0, %v1489_v2 }
 0x159   :  { %v1493_v45 = vpop.eup %1492  ;;  %1105 = vst.msk [vmem:[%s2467_s4 + $0x1c0] sm:$0xff] %vm1048_vm3, %v1040_v39  ;;  %v1011_v55 = vmul.f32 %v1491_v12, %v2218_v33 }
 0x15a   :  { %v1495_v51 = vpop.eup %1494  ;;  %v1043_v20 = vmul.f32 %v1493_v45, %v2238_v10  ;;  %1512 = vrcp.f32 %v919_v29 }
 0x15b   :  { %v1497_v44 = vpop.eup %1496  ;;  %1076 = vst.msk [vmem:[%s2467_s4 + $0xd8] sm:$0xff] %vm1048_vm3, %v1011_v55  ;;  %v1009_v41 = vmul.f32 %v1495_v51, %v2242_v25 }
 0x15c   :  { %v1499_v42 = vpop.eup %1498  ;;  %1108 = vst.msk [vmem:[%s2467_s4 + $0x1d8] sm:$0xff] %vm1048_vm3, %v1043_v20  ;;  %v1041_v33 = vmul.f32 %v1497_v44, %v2255_v16 }
 0x15d   :  { %v1501_v36 = vpop.eup %1500  ;;  %1074 = vst.msk [vmem:[%s2467_s4 + $0xc8] sm:$0xff] %vm1048_vm3, %v1009_v41  ;;  %v1014_v10 = vmul.f32 %v1499_v42, %v2262_v24 }
 0x15e   :  { %v1503_v37 = vpop.eup %1502  ;;  %1106 = vst.msk [vmem:[%s2467_s4 + $0x1c8] sm:$0xff] %vm1048_vm3, %v1041_v33  ;;  %v1046_v25 = vmul.f32 %v1501_v36, %v2267_v38 }
 0x15f   :  { %v1505_v11 = vpop.eup %1504  ;;  %1079 = vst.msk [vmem:[%s2467_s4 + $0xf0] sm:$0xff] %vm1048_vm3, %v1014_v10  ;;  %v885_v16 = vadd.f32 1.0, %v1503_v37 }
 0x160   :  { %v1507_v52 = vpop.eup %1506  ;;  %1111 = vst.msk [vmem:[%s2467_s4 + $0x1f0] sm:$0xff] %vm1048_vm3, %v1046_v25  ;;  %v917_v24 = vadd.f32 1.0, %v1505_v11 }
 0x161   :  { %v1509_v14 = vpop.eup %1508  ;;  %v1012_v59 = vmul.f32 %v1507_v52, %v2280_v13  ;;  %1514 = vrcp.f32 %v885_v16 }
 0x162   :  { %v1511_v15 = vpop.eup %1510  ;;  %v1044_v38 = vmul.f32 %v1509_v14, %v2301_v31  ;;  %1516 = vrcp.f32 %v917_v24 }
 0x163   :  { %1077 = vst.msk [vmem:[%s2467_s4 + $0xe0] sm:$0xff] %vm1048_vm3, %v1012_v59  ;;  %v1015_v63 = vmul.f32 %v1511_v15, %v2304_v57 }
 0x164   :  { %1109 = vst.msk [vmem:[%s2467_s4 + $0x1e0] sm:$0xff] %vm1048_vm3, %v1044_v38 }
 0x165   :  { %1080 = vst.msk [vmem:[%s2467_s4 + $0xf8] sm:$0xff] %vm1048_vm3, %v1015_v63 }
 0x167   :  { %v1513_v13 = vpop.eup %1512 }
 0x168   :  { %v1047_v31 = vmul.f32 %v1513_v13, %v2332_v35 }
 0x16a   :  { %1112 = vst.msk [vmem:[%s2467_s4 + $0x1f8] sm:$0xff] %vm1048_vm3, %v1047_v31 }
 0x16e   :  { %v1515_v62 = vpop.eup %1514 }
 0x16f   :  { %v1517_v57 = vpop.eup %1516  ;;  %v1013_v47 = vmul.f32 %v1515_v62, %v2361_v18 }
 0x170   :  { %v1045_v9 = vmul.f32 %v1517_v57, %v2364_v32 }
 0x171   :  { %1078 = vst.msk [vmem:[%s2467_s4 + $0xe8] sm:$0xff] %vm1048_vm3, %v1013_v47 }
 0x172   :  { %1110 = vst.msk [vmem:[%s2467_s4 + $0x1e8] sm:$0xff] %vm1048_vm3, %v1045_v9 }

</bundles_post_ra>
